<compile_context>
chip_gen: v7x
topology: tpu7x:2x2x1
jax: 0.10.0
libtpu: 0.0.40
codegen_flags: <defaults>
</compile_context>

<pallas_src>
import functools

import jax
import jax.numpy as jnp
from jax import lax
from jax.experimental import pallas as pl
from jax.experimental.pallas import tpu as pltpu


def _round_up(x, m):
    return ((x + m - 1) // m) * m


# ----------------------------- Pallas kernel ------------------------------ #

def _bilstm_kernel(x_ref, w_in_ref, b_in_ref, w_hh_ref, out_ref,
                   act_scr, xg_scr, *, seq_len, batch_p, hidden_p):
    """One grid step == one BiLSTM layer (forward + backward fused).

    x_ref    : (S*Bp, Dp)       padded input, real features in lanes [0:D0)
    w_in_ref : (1, Dp, 16*Hp)   input->gate weights, both directions, gate-major
                                interleaved; cols [0:8Hp) = fwd ("A", time t),
                                cols [8Hp:16Hp) = bwd ("B", time S-1-t)
    b_in_ref : (1, 1, 16*Hp)    pre-summed b_ih + b_hh in the same layout
    w_hh_ref : (1, 2*Hp, 8*Hp)  block-diagonal (per direction) recurrent weights
    out_ref  : (S*Bp, 2*Hp)     last layer's output, rows = time*Bp, [fwd | bwd]
    act_scr  : (S*Bp, Dp)       layer activations, persists across grid steps
    xg_scr   : (S*Bp, 16*Hp)    hoisted input projection for the whole sequence
    """
    S, Bp, Hp = seq_len, batch_p, hidden_p
    GW = 2 * Hp              # combined (fwd | bwd) state width, multiple of 128
    NG = 4 * GW              # gate width of one direction-part (A or B)

    @pl.when(pl.program_id(0) == 0)
    def _():
        act_scr[...] = x_ref[...]

    # Hoisted, time-invariant input projection: ONE batched MXU matmul for the
    # whole sequence and both directions; biases are already folded in.
    xg_scr[...] = (jnp.dot(act_scr[...], w_in_ref[0],
                           preferred_element_type=jnp.float32)
                   + b_in_ref[0])

    w_hh = w_hh_ref[0]                       # (2*Hp, 8*Hp), hoisted out of loop

    def step(t, carry):
        h, c = carry                         # each (Bp, 2*Hp): [fwd | bwd]
        rev = S - 1 - t
        r_f = pl.multiple_of(t * Bp, Bp)
        r_b = pl.multiple_of(rev * Bp, Bp)
        # fwd reads time t, bwd reads time rev; each half carries zeros in the
        # other direction's gate slots, so a single add combines them.
        g_in = (xg_scr[pl.ds(r_f, Bp), 0:NG]
                + xg_scr[pl.ds(r_b, Bp), NG:2 * NG])            # (Bp, 8*Hp)
        states = g_in + jnp.dot(h, w_hh, preferred_element_type=jnp.float32)
        sig = jax.nn.sigmoid(states)          # full-width transcendentals (EUP)
        tnh = jnp.tanh(states)
        i_s = sig[:, 0 * GW:1 * GW]
        f_s = sig[:, 1 * GW:2 * GW]
        g_t = tnh[:, 2 * GW:3 * GW]
        o_s = sig[:, 3 * GW:4 * GW]
        # Non-standard cell: matches the reference LSTMblock exactly.
        c_new = c * i_s + f_s * g_t
        h_new = jnp.tanh(c_new) * o_s
        # Write straight into the next layer's activation buffer:
        #   fwd hidden -> time t,   lanes [0:Hp)
        #   bwd hidden -> time rev, lanes [Hp:2*Hp)   (i.e. already time-flipped)
        act_scr[pl.ds(r_f, Bp), 0:Hp] = h_new[:, 0:Hp]
        act_scr[pl.ds(r_b, Bp), Hp:GW] = h_new[:, Hp:GW]
        return h_new, c_new

    z = jnp.zeros((Bp, GW), jnp.float32)
    lax.fori_loop(0, S, step, (z, z), unroll=True)

    # Reproduce the reference's in-place ht_minus_1.zero_() aliasing: the LAST
    # forward hidden state and the (post-flip) time-0 backward hidden state of
    # every layer are zeroed before being consumed downstream.
    act_scr[(S - 1) * Bp:S * Bp, 0:Hp] = jnp.zeros((Bp, Hp), jnp.float32)
    act_scr[0:Bp, Hp:GW] = jnp.zeros((Bp, Hp), jnp.float32)

    out_ref[...] = act_scr[:, 0:GW]


# --------------------------- weight preparation ---------------------------- #

def _interleave_gates(w_ih, b_ih, w_hh, b_hh, H, Hp, dir_off):
    """Scatter one direction's torch-layout weights into the fused gate layout.

    Column layout (width 8*Hp): gate g in {i,f,g,o} occupies cols [g*2Hp,(g+1)*2Hp);
    within a gate block, lanes [0:Hp) are forward, [Hp:2Hp) backward; only the
    first H lanes of each half are real (the rest stay zero -> hidden padding).
    """
    d_raw = w_ih.shape[1]
    NG = 8 * Hp
    w_ih_il = jnp.zeros((d_raw, NG), jnp.float32)
    w_hh_il = jnp.zeros((H, NG), jnp.float32)
    b_il = jnp.zeros((NG,), jnp.float32)
    b_sum = b_ih + b_hh                      # biases pre-summed once
    for g in range(4):
        c0 = g * 2 * Hp + dir_off
        w_ih_il = w_ih_il.at[:, c0:c0 + H].set(w_ih[g * H:(g + 1) * H, :].T)
        w_hh_il = w_hh_il.at[:, c0:c0 + H].set(w_hh[g * H:(g + 1) * H, :].T)
        b_il = b_il.at[c0:c0 + H].set(b_sum[g * H:(g + 1) * H])
    return w_ih_il, b_il, w_hh_il


def _prep_layer(pf, pb, H, Hp, Dp, row_index):
    NG = 8 * Hp
    wfi, bfi, wfh = _interleave_gates(pf["w_ih"], pf["b_ih"], pf["w_hh"],
                                      pf["b_hh"], H, Hp, 0)
    wbi, bbi, wbh = _interleave_gates(pb["w_ih"], pb["b_ih"], pb["w_hh"],
                                      pb["b_hh"], H, Hp, Hp)
    # Input->gate weight: cols [0:NG) = forward part ("A", read at time t),
    # cols [NG:2NG) = backward part ("B", read at time S-1-t).
    w_in = jnp.zeros((Dp, 2 * NG), jnp.float32)
    w_in = w_in.at[row_index, 0:NG].set(wfi)
    w_in = w_in.at[row_index, NG:2 * NG].set(wbi)
    b_in = jnp.concatenate([bfi, bbi]).reshape(1, 2 * NG)
    # Recurrent weight: block-diagonal per direction so ONE (Bp,2Hp)x(2Hp,8Hp)
    # MXU matmul per time step drives both directions.
    w_hh = jnp.zeros((2 * Hp, NG), jnp.float32)
    w_hh = w_hh.at[0:H, :].set(wfh)
    w_hh = w_hh.at[Hp:Hp + H, :].set(wbh)
    return w_in, b_in, w_hh


def prepare_bilstm_weights(params, input_size, hidden_size, num_layers):
    """Pack raw per-direction weights into the fused, padded kernel layout."""
    H = hidden_size
    Hp = _round_up(H, 64)                       # 2*Hp is lane-aligned
    Dp = max(2 * Hp, _round_up(input_size, 128))
    row0 = jnp.arange(input_size, dtype=jnp.int32)
    rowl = jnp.concatenate([jnp.arange(H, dtype=jnp.int32),
                            Hp + jnp.arange(H, dtype=jnp.int32)])
    w_in, b_in, w_hh = [], [], []
    for layer in range(num_layers):
        ri = row0 if layer == 0 else rowl
        wi, bi, wh = _prep_layer(params["fwd"][layer], params["bwd"][layer],
                                 H, Hp, Dp, ri)
        w_in.append(wi); b_in.append(bi); w_hh.append(wh)
    return {"w_in": jnp.stack(w_in),            # (L, Dp, 16*Hp)
            "b_in": jnp.stack(b_in),            # (L, 1, 16*Hp)
            "w_hh": jnp.stack(w_hh)}            # (L, 2*Hp, 8*Hp)


# ------------------------------ JAX wrapper -------------------------------- #

def bilstm_forward(x, prepped, hidden_size):
    """x: (seq_len, batch, input_size) -> (seq_len, batch, 2*hidden_size)."""
    S, B, D0 = x.shape
    H = hidden_size
    w_in_all, b_in_all, w_hh_all = prepped["w_in"], prepped["b_in"], prepped["w_hh"]
    L, Dp, _ = w_in_all.shape
    Hp = w_hh_all.shape[1] // 2
    Bp = _round_up(B, 8)                        # sublane-aligned batch

    # Pad input into the (S*Bp, Dp) 2-D layout used by the kernel.
    x_p = jnp.zeros((S, Bp, Dp), jnp.float32).at[:, :B, :D0].set(x)
    x2d = x_p.reshape(S * Bp, Dp)

    kernel = functools.partial(_bilstm_kernel, seq_len=S, batch_p=Bp, hidden_p=Hp)
    out2d = pl.pallas_call(
        kernel,
        out_shape=jax.ShapeDtypeStruct((S * Bp, 2 * Hp), jnp.float32),
        grid_spec=pltpu.PrefetchScalarGridSpec(
            num_scalar_prefetch=0,
            grid=(L,),                                       # one step per layer
            in_specs=[
                pl.BlockSpec((S * Bp, Dp), lambda l: (0, 0)),
                pl.BlockSpec((1, Dp, 16 * Hp), lambda l: (l, 0, 0)),
                pl.BlockSpec((1, 1, 16 * Hp), lambda l: (l, 0, 0)),
                pl.BlockSpec((1, 2 * Hp, 8 * Hp), lambda l: (l, 0, 0)),
            ],
            out_specs=pl.BlockSpec((S * Bp, 2 * Hp), lambda l: (0, 0)),
            scratch_shapes=[
                pltpu.VMEM((S * Bp, Dp), jnp.float32),       # layer activations
                pltpu.VMEM((S * Bp, 16 * Hp), jnp.float32),  # hoisted input proj
            ],
        ),
        compiler_params=pltpu.CompilerParams(
            dimension_semantics=("arbitrary",)),             # layers are sequential
    )(x2d, w_in_all, b_in_all, w_hh_all)

    out = out2d.reshape(S, Bp, 2 * Hp)
    # Strip batch / hidden padding and assemble [fwd || bwd].
    return jnp.concatenate([out[:, :B, 0:H], out[:, :B, Hp:Hp + H]], axis=-1)


# ------------------------------ initialization ----------------------------- #

def _init_linear(key, in_features, out_features):
    # Mimics torch.nn.Linear default init: U(-1/sqrt(fan_in), 1/sqrt(fan_in)).
    k = 1.0 / float(in_features) ** 0.5
    kw, kb = jax.random.split(key)
    w = jax.random.uniform(kw, (out_features, in_features), jnp.float32, -k, k)
    b = jax.random.uniform(kb, (out_features,), jnp.float32, -k, k)
    return w, b


def _init_block(key, in_size, hidden_size):
    k1, k2 = jax.random.split(key)
    w_ih, b_ih = _init_linear(k1, in_size, 4 * hidden_size)
    w_hh, b_hh = _init_linear(k2, hidden_size, 4 * hidden_size)
    return {"w_ih": w_ih, "b_ih": b_ih, "w_hh": w_hh, "b_hh": b_hh}


def init_bilstm_params(key, input_size, hidden_size, num_layers):
    params = {"fwd": [], "bwd": []}
    keys = jax.random.split(key, 2 * num_layers)
    for layer in range(num_layers):
        d_in = input_size if layer == 0 else 2 * hidden_size
        params["fwd"].append(_init_block(keys[layer], d_in, hidden_size))
        params["bwd"].append(_init_block(keys[num_layers + layer], d_in, hidden_size))
    return params


# --------------------------- pure-JAX reference ----------------------------- #

def _ref_bilstm(x, params, num_layers, hidden_size):
    H = hidden_size

    def cell(xt, h, c, p):
        states = xt @ p["w_ih"].T + p["b_ih"] + h @ p["w_hh"].T + p["b_hh"]
        i, f, g, o = (states[:, :H], states[:, H:2 * H],
                      states[:, 2 * H:3 * H], states[:, 3 * H:])
        ct = c * jax.nn.sigmoid(i) + jax.nn.sigmoid(f) * jnp.tanh(g)
        ht = jnp.tanh(ct) * jax.nn.sigmoid(o)
        return ht, ct

    inp = x
    S, B = x.shape[:2]
    for layer in range(num_layers):
        h = jnp.zeros((B, H)); c = jnp.zeros((B, H))
        hf = []
        for t in range(S):
            h, c = cell(inp[t], h, c, params["fwd"][layer]); hf.append(h)
        h = jnp.zeros((B, H)); c = jnp.zeros((B, H))
        hb = []
        for t in range(S - 1, -1, -1):
            h, c = cell(inp[t], h, c, params["bwd"][layer]); hb.append(h)
        hf = jnp.stack(hf).at[-1].set(0.0)
        hb = jnp.flip(jnp.stack(hb), axis=0).at[0].set(0.0)
        inp = jnp.concatenate([hf, hb], axis=-1)
    return inp


# ----------------------------------- main ----------------------------------- #

if __name__ == "__main__":
    seq_len, batch, input_size, hidden_size, num_layers = 8, 4, 16, 32, 2

    key = jax.random.PRNGKey(0)
    kx, kp = jax.random.split(key)
    x = jax.random.normal(kx, (seq_len, batch, input_size), dtype=jnp.float32)
    params = init_bilstm_params(kp, input_size, hidden_size, num_layers)

    # One-time weight packing (outside the hot path).
    prepped = prepare_bilstm_weights(params, input_size, hidden_size, num_layers)

    run = jax.jit(functools.partial(bilstm_forward, hidden_size=hidden_size))
    out = jax.block_until_ready(run(x, prepped))

    ref = _ref_bilstm(x, params, num_layers, hidden_size)
    assert out.shape == (seq_len, batch, 2 * hidden_size)
    assert jnp.allclose(out, ref, atol=1e-4, rtol=1e-4), float(
        jnp.max(jnp.abs(out - ref)))

    print("KERNEL_OK")
</pallas_src>

<mosaic_0001>
module attributes {stable_mosaic.version = 11 : i64} {
  func.func @_bilstm_kernel(%arg0: i32, %arg1: memref<64x128xf32, #tpu.memory_space<vmem>>, %arg2: memref<1x128x1024xf32, #tpu.memory_space<vmem>>, %arg3: memref<1x1x1024xf32, #tpu.memory_space<vmem>>, %arg4: memref<1x128x512xf32, #tpu.memory_space<vmem>>, %arg5: memref<64x128xf32, #tpu.memory_space<vmem>>, %arg6: memref<64x128xf32, #tpu.memory_space<vmem>>, %arg7: memref<64x1024xf32, #tpu.memory_space<vmem>>) attributes {dimension_semantics = [#tpu.dimension_semantics<arbitrary>], iteration_bounds = array<i64: 2>, scalar_prefetch = 0 : i64, scratch_operands = 2 : i64, tpu.core_type = #tpu.core_type<tc>, window_params = [{pipeline_mode = #tpu.pipeline_mode<synchronous>, transform_indices = @transform_0, window_bounds = array<i64: 64, 128>}, {transform_indices = @transform_1, window_bounds = array<i64: 1, 128, 1024>}, {transform_indices = @transform_2, window_bounds = array<i64: 1, 1, 1024>}, {transform_indices = @transform_3, window_bounds = array<i64: 1, 128, 512>}, {pipeline_mode = #tpu.pipeline_mode<synchronous>, transform_indices = @transform_4, window_bounds = array<i64: 64, 128>}]} {
    %c0_i32 = arith.constant 0 : i32
    %0 = arith.cmpi eq, %arg0, %c0_i32 : i32
    %1 = arith.extui %0 : i1 to i32
    %c0_i32_0 = arith.constant 0 : i32
    %2 = arith.cmpi ne, %1, %c0_i32_0 : i32
    scf.if %2 {
      %c0_94 = arith.constant 0 : index
      %c0_95 = arith.constant 0 : index
      %285 = vector.load %arg1[%c0_94, %c0_95] : memref<64x128xf32, #tpu.memory_space<vmem>>, vector<64x128xf32>
      %c0_96 = arith.constant 0 : index
      %c0_97 = arith.constant 0 : index
      %286 = vector.load %arg6[%c0_96, %c0_97] : memref<64x128xf32, #tpu.memory_space<vmem>>, vector<64x128xf32>
      tpu.vector_store %arg6[%c0_96, %c0_97], %285 {strides = array<i32>} : memref<64x128xf32, #tpu.memory_space<vmem>>, vector<64x128xf32>,
    } else {
    }
    %c0 = arith.constant 0 : index
    %c0_1 = arith.constant 0 : index
    %3 = vector.load %arg6[%c0, %c0_1] : memref<64x128xf32, #tpu.memory_space<vmem>>, vector<64x128xf32>
    %c0_2 = arith.constant 0 : index
    %c0_3 = arith.constant 0 : index
    %c0_4 = arith.constant 0 : index
    %4 = vector.load %arg2[%c0_2, %c0_3, %c0_4] : memref<1x128x1024xf32, #tpu.memory_space<vmem>>, vector<1x128x1024xf32>
    %5 = vector.shape_cast %4 : vector<1x128x1024xf32> to vector<128x1024xf32>
    %cst = arith.constant dense<0.000000e+00> : vector<64x1024xf32>
    %6 = tpu.matmul %3, %5, %cst {dimension_numbers = #tpu.dot_dimension_numbers<[1], [0], [0], [1], [0, 0, 1, 1], [], []>} : vector<64x128xf32>, vector<128x1024xf32>, vector<64x1024xf32> -> vector<64x1024xf32>
    %c0_5 = arith.constant 0 : index
    %c0_6 = arith.constant 0 : index
    %c0_7 = arith.constant 0 : index
    %7 = vector.load %arg3[%c0_5, %c0_6, %c0_7] : memref<1x1x1024xf32, #tpu.memory_space<vmem>>, vector<1x1x1024xf32>
    %8 = vector.shape_cast %7 : vector<1x1x1024xf32> to vector<1x1024xf32>
    %9 = vector.broadcast %8 : vector<1x1024xf32> to vector<64x1024xf32>
    %10 = arith.addf %6, %9 : vector<64x1024xf32>
    %c0_8 = arith.constant 0 : index
    %c0_9 = arith.constant 0 : index
    %11 = vector.load %arg7[%c0_8, %c0_9] : memref<64x1024xf32, #tpu.memory_space<vmem>>, vector<64x1024xf32>
    tpu.vector_store %arg7[%c0_8, %c0_9], %10 {strides = array<i32>} : memref<64x1024xf32, #tpu.memory_space<vmem>>, vector<64x1024xf32>,
    %c0_10 = arith.constant 0 : index
    %c0_11 = arith.constant 0 : index
    %c0_12 = arith.constant 0 : index
    %12 = vector.load %arg4[%c0_10, %c0_11, %c0_12] : memref<1x128x512xf32, #tpu.memory_space<vmem>>, vector<1x128x512xf32>
    %13 = vector.shape_cast %12 : vector<1x128x512xf32> to vector<128x512xf32>
    %cst_13 = arith.constant 0.000000e+00 : f32
    %14 = vector.broadcast %cst_13 : f32 to vector<8x128xf32>
    %c0_i32_14 = arith.constant 0 : i32
    %c7_i32 = arith.constant 7 : i32
    %15 = arith.subi %c7_i32, %c0_i32_14 : i32
    %c8_i32 = arith.constant 8 : i32
    %16 = arith.muli %c0_i32_14, %c8_i32 : i32
    %17 = tpu.assume_multiple %16, 8 : i32
    %c8_i32_15 = arith.constant 8 : i32
    %18 = arith.muli %15, %c8_i32_15 : i32
    %19 = tpu.assume_multiple %18, 8 : i32
    %20 = arith.index_cast %17 : i32 to index
    %c0_16 = arith.constant 0 : index
    %21 = vector.load %arg7[%20, %c0_16] : memref<64x1024xf32, #tpu.memory_space<vmem>>, vector<8x512xf32>
    %22 = arith.index_cast %19 : i32 to index
    %c512 = arith.constant 512 : index
    %23 = vector.load %arg7[%22, %c512] : memref<64x1024xf32, #tpu.memory_space<vmem>>, vector<8x512xf32>
    %24 = arith.addf %21, %23 : vector<8x512xf32>
    %cst_17 = arith.constant dense<0.000000e+00> : vector<8x512xf32>
    %25 = tpu.matmul %14, %13, %cst_17 {dimension_numbers = #tpu.dot_dimension_numbers<[1], [0], [0], [1], [0, 0, 1, 1], [], []>} : vector<8x128xf32>, vector<128x512xf32>, vector<8x512xf32> -> vector<8x512xf32>
    %26 = arith.addf %24, %25 : vector<8x512xf32>
    %27 = arith.negf %26 : vector<8x512xf32>
    %28 = math.exp %27 : vector<8x512xf32>
    %cst_18 = arith.constant 1.000000e+00 : f32
    %29 = vector.broadcast %cst_18 : f32 to vector<8x512xf32>
    %30 = arith.addf %29, %28 : vector<8x512xf32>
    %31 = arith.divf %29, %30 : vector<8x512xf32>
    %32 = math.tanh %26 : vector<8x512xf32>
    %33 = vector.extract_strided_slice %31 {offsets = [0, 0], sizes = [8, 128], strides = [1, 1]} : vector<8x512xf32> to vector<8x128xf32>
    %34 = vector.extract_strided_slice %31 {offsets = [0, 128], sizes = [8, 128], strides = [1, 1]} : vector<8x512xf32> to vector<8x128xf32>
    %35 = vector.extract_strided_slice %32 {offsets = [0, 256], sizes = [8, 128], strides = [1, 1]} : vector<8x512xf32> to vector<8x128xf32>
    %36 = vector.extract_strided_slice %31 {offsets = [0, 384], sizes = [8, 128], strides = [1, 1]} : vector<8x512xf32> to vector<8x128xf32>
    %37 = arith.mulf %14, %33 : vector<8x128xf32>
    %38 = arith.mulf %34, %35 : vector<8x128xf32>
    %39 = arith.addf %37, %38 : vector<8x128xf32>
    %40 = math.tanh %39 : vector<8x128xf32>
    %41 = arith.mulf %40, %36 : vector<8x128xf32>
    %42 = vector.extract_strided_slice %41 {offsets = [0, 0], sizes = [8, 64], strides = [1, 1]} : vector<8x128xf32> to vector<8x64xf32>
    %43 = arith.index_cast %17 : i32 to index
    %c0_19 = arith.constant 0 : index
    %44 = vector.load %arg6[%43, %c0_19] : memref<64x128xf32, #tpu.memory_space<vmem>>, vector<8x64xf32>
    tpu.vector_store %arg6[%43, %c0_19], %42 {strides = array<i32>} : memref<64x128xf32, #tpu.memory_space<vmem>>, vector<8x64xf32>,
    %45 = vector.extract_strided_slice %41 {offsets = [0, 64], sizes = [8, 64], strides = [1, 1]} : vector<8x128xf32> to vector<8x64xf32>
    %46 = arith.index_cast %19 : i32 to index
    %c64 = arith.constant 64 : index
    %47 = vector.load %arg6[%46, %c64] : memref<64x128xf32, #tpu.memory_space<vmem>>, vector<8x64xf32>
    tpu.vector_store %arg6[%46, %c64], %45 {strides = array<i32>} : memref<64x128xf32, #tpu.memory_space<vmem>>, vector<8x64xf32>,
    %c1_i32 = arith.constant 1 : i32
    %c7_i32_20 = arith.constant 7 : i32
    %48 = arith.subi %c7_i32_20, %c1_i32 : i32
    %c8_i32_21 = arith.constant 8 : i32
    %49 = arith.muli %c1_i32, %c8_i32_21 : i32
    %50 = tpu.assume_multiple %49, 8 : i32
    %c8_i32_22 = arith.constant 8 : i32
    %51 = arith.muli %48, %c8_i32_22 : i32
    %52 = tpu.assume_multiple %51, 8 : i32
    %53 = arith.index_cast %50 : i32 to index
    %c0_23 = arith.constant 0 : index
    %54 = vector.load %arg7[%53, %c0_23] : memref<64x1024xf32, #tpu.memory_space<vmem>>, vector<8x512xf32>
    %55 = arith.index_cast %52 : i32 to index
    %c512_24 = arith.constant 512 : index
    %56 = vector.load %arg7[%55, %c512_24] : memref<64x1024xf32, #tpu.memory_space<vmem>>, vector<8x512xf32>
    %57 = arith.addf %54, %56 : vector<8x512xf32>
    %cst_25 = arith.constant dense<0.000000e+00> : vector<8x512xf32>
    %58 = tpu.matmul %41, %13, %cst_25 {dimension_numbers = #tpu.dot_dimension_numbers<[1], [0], [0], [1], [0, 0, 1, 1], [], []>} : vector<8x128xf32>, vector<128x512xf32>, vector<8x512xf32> -> vector<8x512xf32>
    %59 = arith.addf %57, %58 : vector<8x512xf32>
    %60 = arith.negf %59 : vector<8x512xf32>
    %61 = math.exp %60 : vector<8x512xf32>
    %cst_26 = arith.constant 1.000000e+00 : f32
    %62 = vector.broadcast %cst_26 : f32 to vector<8x512xf32>
    %63 = arith.addf %62, %61 : vector<8x512xf32>
    %64 = arith.divf %62, %63 : vector<8x512xf32>
    %65 = math.tanh %59 : vector<8x512xf32>
    %66 = vector.extract_strided_slice %64 {offsets = [0, 0], sizes = [8, 128], strides = [1, 1]} : vector<8x512xf32> to vector<8x128xf32>
    %67 = vector.extract_strided_slice %64 {offsets = [0, 128], sizes = [8, 128], strides = [1, 1]} : vector<8x512xf32> to vector<8x128xf32>
    %68 = vector.extract_strided_slice %65 {offsets = [0, 256], sizes = [8, 128], strides = [1, 1]} : vector<8x512xf32> to vector<8x128xf32>
    %69 = vector.extract_strided_slice %64 {offsets = [0, 384], sizes = [8, 128], strides = [1, 1]} : vector<8x512xf32> to vector<8x128xf32>
    %70 = arith.mulf %39, %66 : vector<8x128xf32>
    %71 = arith.mulf %67, %68 : vector<8x128xf32>
    %72 = arith.addf %70, %71 : vector<8x128xf32>
    %73 = math.tanh %72 : vector<8x128xf32>
    %74 = arith.mulf %73, %69 : vector<8x128xf32>
    %75 = vector.extract_strided_slice %74 {offsets = [0, 0], sizes = [8, 64], strides = [1, 1]} : vector<8x128xf32> to vector<8x64xf32>
    %76 = arith.index_cast %50 : i32 to index
    %c0_27 = arith.constant 0 : index
    %77 = vector.load %arg6[%76, %c0_27] : memref<64x128xf32, #tpu.memory_space<vmem>>, vector<8x64xf32>
    tpu.vector_store %arg6[%76, %c0_27], %75 {strides = array<i32>} : memref<64x128xf32, #tpu.memory_space<vmem>>, vector<8x64xf32>,
    %78 = vector.extract_strided_slice %74 {offsets = [0, 64], sizes = [8, 64], strides = [1, 1]} : vector<8x128xf32> to vector<8x64xf32>
    %79 = arith.index_cast %52 : i32 to index
    %c64_28 = arith.constant 64 : index
    %80 = vector.load %arg6[%79, %c64_28] : memref<64x128xf32, #tpu.memory_space<vmem>>, vector<8x64xf32>
    tpu.vector_store %arg6[%79, %c64_28], %78 {strides = array<i32>} : memref<64x128xf32, #tpu.memory_space<vmem>>, vector<8x64xf32>,
    %c2_i32 = arith.constant 2 : i32
    %c7_i32_29 = arith.constant 7 : i32
    %81 = arith.subi %c7_i32_29, %c2_i32 : i32
    %c8_i32_30 = arith.constant 8 : i32
    %82 = arith.muli %c2_i32, %c8_i32_30 : i32
    %83 = tpu.assume_multiple %82, 8 : i32
    %c8_i32_31 = arith.constant 8 : i32
    %84 = arith.muli %81, %c8_i32_31 : i32
    %85 = tpu.assume_multiple %84, 8 : i32
    %86 = arith.index_cast %83 : i32 to index
    %c0_32 = arith.constant 0 : index
    %87 = vector.load %arg7[%86, %c0_32] : memref<64x1024xf32, #tpu.memory_space<vmem>>, vector<8x512xf32>
    %88 = arith.index_cast %85 : i32 to index
    %c512_33 = arith.constant 512 : index
    %89 = vector.load %arg7[%88, %c512_33] : memref<64x1024xf32, #tpu.memory_space<vmem>>, vector<8x512xf32>
    %90 = arith.addf %87, %89 : vector<8x512xf32>
    %cst_34 = arith.constant dense<0.000000e+00> : vector<8x512xf32>
    %91 = tpu.matmul %74, %13, %cst_34 {dimension_numbers = #tpu.dot_dimension_numbers<[1], [0], [0], [1], [0, 0, 1, 1], [], []>} : vector<8x128xf32>, vector<128x512xf32>, vector<8x512xf32> -> vector<8x512xf32>
    %92 = arith.addf %90, %91 : vector<8x512xf32>
    %93 = arith.negf %92 : vector<8x512xf32>
    %94 = math.exp %93 : vector<8x512xf32>
    %cst_35 = arith.constant 1.000000e+00 : f32
    %95 = vector.broadcast %cst_35 : f32 to vector<8x512xf32>
    %96 = arith.addf %95, %94 : vector<8x512xf32>
    %97 = arith.divf %95, %96 : vector<8x512xf32>
    %98 = math.tanh %92 : vector<8x512xf32>
    %99 = vector.extract_strided_slice %97 {offsets = [0, 0], sizes = [8, 128], strides = [1, 1]} : vector<8x512xf32> to vector<8x128xf32>
    %100 = vector.extract_strided_slice %97 {offsets = [0, 128], sizes = [8, 128], strides = [1, 1]} : vector<8x512xf32> to vector<8x128xf32>
    %101 = vector.extract_strided_slice %98 {offsets = [0, 256], sizes = [8, 128], strides = [1, 1]} : vector<8x512xf32> to vector<8x128xf32>
    %102 = vector.extract_strided_slice %97 {offsets = [0, 384], sizes = [8, 128], strides = [1, 1]} : vector<8x512xf32> to vector<8x128xf32>
    %103 = arith.mulf %72, %99 : vector<8x128xf32>
    %104 = arith.mulf %100, %101 : vector<8x128xf32>
    %105 = arith.addf %103, %104 : vector<8x128xf32>
    %106 = math.tanh %105 : vector<8x128xf32>
    %107 = arith.mulf %106, %102 : vector<8x128xf32>
    %108 = vector.extract_strided_slice %107 {offsets = [0, 0], sizes = [8, 64], strides = [1, 1]} : vector<8x128xf32> to vector<8x64xf32>
    %109 = arith.index_cast %83 : i32 to index
    %c0_36 = arith.constant 0 : index
    %110 = vector.load %arg6[%109, %c0_36] : memref<64x128xf32, #tpu.memory_space<vmem>>, vector<8x64xf32>
    tpu.vector_store %arg6[%109, %c0_36], %108 {strides = array<i32>} : memref<64x128xf32, #tpu.memory_space<vmem>>, vector<8x64xf32>,
    %111 = vector.extract_strided_slice %107 {offsets = [0, 64], sizes = [8, 64], strides = [1, 1]} : vector<8x128xf32> to vector<8x64xf32>
    %112 = arith.index_cast %85 : i32 to index
    %c64_37 = arith.constant 64 : index
    %113 = vector.load %arg6[%112, %c64_37] : memref<64x128xf32, #tpu.memory_space<vmem>>, vector<8x64xf32>
    tpu.vector_store %arg6[%112, %c64_37], %111 {strides = array<i32>} : memref<64x128xf32, #tpu.memory_space<vmem>>, vector<8x64xf32>,
    %c3_i32 = arith.constant 3 : i32
    %c7_i32_38 = arith.constant 7 : i32
    %114 = arith.subi %c7_i32_38, %c3_i32 : i32
    %c8_i32_39 = arith.constant 8 : i32
    %115 = arith.muli %c3_i32, %c8_i32_39 : i32
    %116 = tpu.assume_multiple %115, 8 : i32
    %c8_i32_40 = arith.constant 8 : i32
    %117 = arith.muli %114, %c8_i32_40 : i32
    %118 = tpu.assume_multiple %117, 8 : i32
    %119 = arith.index_cast %116 : i32 to index
    %c0_41 = arith.constant 0 : index
    %120 = vector.load %arg7[%119, %c0_41] : memref<64x1024xf32, #tpu.memory_space<vmem>>, vector<8x512xf32>
    %121 = arith.index_cast %118 : i32 to index
    %c512_42 = arith.constant 512 : index
    %122 = vector.load %arg7[%121, %c512_42] : memref<64x1024xf32, #tpu.memory_space<vmem>>, vector<8x512xf32>
    %123 = arith.addf %120, %122 : vector<8x512xf32>
    %cst_43 = arith.constant dense<0.000000e+00> : vector<8x512xf32>
    %124 = tpu.matmul %107, %13, %cst_43 {dimension_numbers = #tpu.dot_dimension_numbers<[1], [0], [0], [1], [0, 0, 1, 1], [], []>} : vector<8x128xf32>, vector<128x512xf32>, vector<8x512xf32> -> vector<8x512xf32>
    %125 = arith.addf %123, %124 : vector<8x512xf32>
    %126 = arith.negf %125 : vector<8x512xf32>
    %127 = math.exp %126 : vector<8x512xf32>
    %cst_44 = arith.constant 1.000000e+00 : f32
    %128 = vector.broadcast %cst_44 : f32 to vector<8x512xf32>
    %129 = arith.addf %128, %127 : vector<8x512xf32>
    %130 = arith.divf %128, %129 : vector<8x512xf32>
    %131 = math.tanh %125 : vector<8x512xf32>
    %132 = vector.extract_strided_slice %130 {offsets = [0, 0], sizes = [8, 128], strides = [1, 1]} : vector<8x512xf32> to vector<8x128xf32>
    %133 = vector.extract_strided_slice %130 {offsets = [0, 128], sizes = [8, 128], strides = [1, 1]} : vector<8x512xf32> to vector<8x128xf32>
    %134 = vector.extract_strided_slice %131 {offsets = [0, 256], sizes = [8, 128], strides = [1, 1]} : vector<8x512xf32> to vector<8x128xf32>
    %135 = vector.extract_strided_slice %130 {offsets = [0, 384], sizes = [8, 128], strides = [1, 1]} : vector<8x512xf32> to vector<8x128xf32>
    %136 = arith.mulf %105, %132 : vector<8x128xf32>
    %137 = arith.mulf %133, %134 : vector<8x128xf32>
    %138 = arith.addf %136, %137 : vector<8x128xf32>
    %139 = math.tanh %138 : vector<8x128xf32>
    %140 = arith.mulf %139, %135 : vector<8x128xf32>
    %141 = vector.extract_strided_slice %140 {offsets = [0, 0], sizes = [8, 64], strides = [1, 1]} : vector<8x128xf32> to vector<8x64xf32>
    %142 = arith.index_cast %116 : i32 to index
    %c0_45 = arith.constant 0 : index
    %143 = vector.load %arg6[%142, %c0_45] : memref<64x128xf32, #tpu.memory_space<vmem>>, vector<8x64xf32>
    tpu.vector_store %arg6[%142, %c0_45], %141 {strides = array<i32>} : memref<64x128xf32, #tpu.memory_space<vmem>>, vector<8x64xf32>,
    %144 = vector.extract_strided_slice %140 {offsets = [0, 64], sizes = [8, 64], strides = [1, 1]} : vector<8x128xf32> to vector<8x64xf32>
    %145 = arith.index_cast %118 : i32 to index
    %c64_46 = arith.constant 64 : index
    %146 = vector.load %arg6[%145, %c64_46] : memref<64x128xf32, #tpu.memory_space<vmem>>, vector<8x64xf32>
    tpu.vector_store %arg6[%145, %c64_46], %144 {strides = array<i32>} : memref<64x128xf32, #tpu.memory_space<vmem>>, vector<8x64xf32>,
    %c4_i32 = arith.constant 4 : i32
    %c7_i32_47 = arith.constant 7 : i32
    %147 = arith.subi %c7_i32_47, %c4_i32 : i32
    %c8_i32_48 = arith.constant 8 : i32
    %148 = arith.muli %c4_i32, %c8_i32_48 : i32
    %149 = tpu.assume_multiple %148, 8 : i32
    %c8_i32_49 = arith.constant 8 : i32
    %150 = arith.muli %147, %c8_i32_49 : i32
    %151 = tpu.assume_multiple %150, 8 : i32
    %152 = arith.index_cast %149 : i32 to index
    %c0_50 = arith.constant 0 : index
    %153 = vector.load %arg7[%152, %c0_50] : memref<64x1024xf32, #tpu.memory_space<vmem>>, vector<8x512xf32>
    %154 = arith.index_cast %151 : i32 to index
    %c512_51 = arith.constant 512 : index
    %155 = vector.load %arg7[%154, %c512_51] : memref<64x1024xf32, #tpu.memory_space<vmem>>, vector<8x512xf32>
    %156 = arith.addf %153, %155 : vector<8x512xf32>
    %cst_52 = arith.constant dense<0.000000e+00> : vector<8x512xf32>
    %157 = tpu.matmul %140, %13, %cst_52 {dimension_numbers = #tpu.dot_dimension_numbers<[1], [0], [0], [1], [0, 0, 1, 1], [], []>} : vector<8x128xf32>, vector<128x512xf32>, vector<8x512xf32> -> vector<8x512xf32>
    %158 = arith.addf %156, %157 : vector<8x512xf32>
    %159 = arith.negf %158 : vector<8x512xf32>
    %160 = math.exp %159 : vector<8x512xf32>
    %cst_53 = arith.constant 1.000000e+00 : f32
    %161 = vector.broadcast %cst_53 : f32 to vector<8x512xf32>
    %162 = arith.addf %161, %160 : vector<8x512xf32>
    %163 = arith.divf %161, %162 : vector<8x512xf32>
    %164 = math.tanh %158 : vector<8x512xf32>
    %165 = vector.extract_strided_slice %163 {offsets = [0, 0], sizes = [8, 128], strides = [1, 1]} : vector<8x512xf32> to vector<8x128xf32>
    %166 = vector.extract_strided_slice %163 {offsets = [0, 128], sizes = [8, 128], strides = [1, 1]} : vector<8x512xf32> to vector<8x128xf32>
    %167 = vector.extract_strided_slice %164 {offsets = [0, 256], sizes = [8, 128], strides = [1, 1]} : vector<8x512xf32> to vector<8x128xf32>
    %168 = vector.extract_strided_slice %163 {offsets = [0, 384], sizes = [8, 128], strides = [1, 1]} : vector<8x512xf32> to vector<8x128xf32>
    %169 = arith.mulf %138, %165 : vector<8x128xf32>
    %170 = arith.mulf %166, %167 : vector<8x128xf32>
    %171 = arith.addf %169, %170 : vector<8x128xf32>
    %172 = math.tanh %171 : vector<8x128xf32>
    %173 = arith.mulf %172, %168 : vector<8x128xf32>
    %174 = vector.extract_strided_slice %173 {offsets = [0, 0], sizes = [8, 64], strides = [1, 1]} : vector<8x128xf32> to vector<8x64xf32>
    %175 = arith.index_cast %149 : i32 to index
    %c0_54 = arith.constant 0 : index
    %176 = vector.load %arg6[%175, %c0_54] : memref<64x128xf32, #tpu.memory_space<vmem>>, vector<8x64xf32>
    tpu.vector_store %arg6[%175, %c0_54], %174 {strides = array<i32>} : memref<64x128xf32, #tpu.memory_space<vmem>>, vector<8x64xf32>,
    %177 = vector.extract_strided_slice %173 {offsets = [0, 64], sizes = [8, 64], strides = [1, 1]} : vector<8x128xf32> to vector<8x64xf32>
    %178 = arith.index_cast %151 : i32 to index
    %c64_55 = arith.constant 64 : index
    %179 = vector.load %arg6[%178, %c64_55] : memref<64x128xf32, #tpu.memory_space<vmem>>, vector<8x64xf32>
    tpu.vector_store %arg6[%178, %c64_55], %177 {strides = array<i32>} : memref<64x128xf32, #tpu.memory_space<vmem>>, vector<8x64xf32>,
    %c5_i32 = arith.constant 5 : i32
    %c7_i32_56 = arith.constant 7 : i32
    %180 = arith.subi %c7_i32_56, %c5_i32 : i32
    %c8_i32_57 = arith.constant 8 : i32
    %181 = arith.muli %c5_i32, %c8_i32_57 : i32
    %182 = tpu.assume_multiple %181, 8 : i32
    %c8_i32_58 = arith.constant 8 : i32
    %183 = arith.muli %180, %c8_i32_58 : i32
    %184 = tpu.assume_multiple %183, 8 : i32
    %185 = arith.index_cast %182 : i32 to index
    %c0_59 = arith.constant 0 : index
    %186 = vector.load %arg7[%185, %c0_59] : memref<64x1024xf32, #tpu.memory_space<vmem>>, vector<8x512xf32>
    %187 = arith.index_cast %184 : i32 to index
    %c512_60 = arith.constant 512 : index
    %188 = vector.load %arg7[%187, %c512_60] : memref<64x1024xf32, #tpu.memory_space<vmem>>, vector<8x512xf32>
    %189 = arith.addf %186, %188 : vector<8x512xf32>
    %cst_61 = arith.constant dense<0.000000e+00> : vector<8x512xf32>
    %190 = tpu.matmul %173, %13, %cst_61 {dimension_numbers = #tpu.dot_dimension_numbers<[1], [0], [0], [1], [0, 0, 1, 1], [], []>} : vector<8x128xf32>, vector<128x512xf32>, vector<8x512xf32> -> vector<8x512xf32>
    %191 = arith.addf %189, %190 : vector<8x512xf32>
    %192 = arith.negf %191 : vector<8x512xf32>
    %193 = math.exp %192 : vector<8x512xf32>
    %cst_62 = arith.constant 1.000000e+00 : f32
    %194 = vector.broadcast %cst_62 : f32 to vector<8x512xf32>
    %195 = arith.addf %194, %193 : vector<8x512xf32>
    %196 = arith.divf %194, %195 : vector<8x512xf32>
    %197 = math.tanh %191 : vector<8x512xf32>
    %198 = vector.extract_strided_slice %196 {offsets = [0, 0], sizes = [8, 128], strides = [1, 1]} : vector<8x512xf32> to vector<8x128xf32>
    %199 = vector.extract_strided_slice %196 {offsets = [0, 128], sizes = [8, 128], strides = [1, 1]} : vector<8x512xf32> to vector<8x128xf32>
    %200 = vector.extract_strided_slice %197 {offsets = [0, 256], sizes = [8, 128], strides = [1, 1]} : vector<8x512xf32> to vector<8x128xf32>
    %201 = vector.extract_strided_slice %196 {offsets = [0, 384], sizes = [8, 128], strides = [1, 1]} : vector<8x512xf32> to vector<8x128xf32>
    %202 = arith.mulf %171, %198 : vector<8x128xf32>
    %203 = arith.mulf %199, %200 : vector<8x128xf32>
    %204 = arith.addf %202, %203 : vector<8x128xf32>
    %205 = math.tanh %204 : vector<8x128xf32>
    %206 = arith.mulf %205, %201 : vector<8x128xf32>
    %207 = vector.extract_strided_slice %206 {offsets = [0, 0], sizes = [8, 64], strides = [1, 1]} : vector<8x128xf32> to vector<8x64xf32>
    %208 = arith.index_cast %182 : i32 to index
    %c0_63 = arith.constant 0 : index
    %209 = vector.load %arg6[%208, %c0_63] : memref<64x128xf32, #tpu.memory_space<vmem>>, vector<8x64xf32>
    tpu.vector_store %arg6[%208, %c0_63], %207 {strides = array<i32>} : memref<64x128xf32, #tpu.memory_space<vmem>>, vector<8x64xf32>,
    %210 = vector.extract_strided_slice %206 {offsets = [0, 64], sizes = [8, 64], strides = [1, 1]} : vector<8x128xf32> to vector<8x64xf32>
    %211 = arith.index_cast %184 : i32 to index
    %c64_64 = arith.constant 64 : index
    %212 = vector.load %arg6[%211, %c64_64] : memref<64x128xf32, #tpu.memory_space<vmem>>, vector<8x64xf32>
    tpu.vector_store %arg6[%211, %c64_64], %210 {strides = array<i32>} : memref<64x128xf32, #tpu.memory_space<vmem>>, vector<8x64xf32>,
    %c6_i32 = arith.constant 6 : i32
    %c7_i32_65 = arith.constant 7 : i32
    %213 = arith.subi %c7_i32_65, %c6_i32 : i32
    %c8_i32_66 = arith.constant 8 : i32
    %214 = arith.muli %c6_i32, %c8_i32_66 : i32
    %215 = tpu.assume_multiple %214, 8 : i32
    %c8_i32_67 = arith.constant 8 : i32
    %216 = arith.muli %213, %c8_i32_67 : i32
    %217 = tpu.assume_multiple %216, 8 : i32
    %218 = arith.index_cast %215 : i32 to index
    %c0_68 = arith.constant 0 : index
    %219 = vector.load %arg7[%218, %c0_68] : memref<64x1024xf32, #tpu.memory_space<vmem>>, vector<8x512xf32>
    %220 = arith.index_cast %217 : i32 to index
    %c512_69 = arith.constant 512 : index
    %221 = vector.load %arg7[%220, %c512_69] : memref<64x1024xf32, #tpu.memory_space<vmem>>, vector<8x512xf32>
    %222 = arith.addf %219, %221 : vector<8x512xf32>
    %cst_70 = arith.constant dense<0.000000e+00> : vector<8x512xf32>
    %223 = tpu.matmul %206, %13, %cst_70 {dimension_numbers = #tpu.dot_dimension_numbers<[1], [0], [0], [1], [0, 0, 1, 1], [], []>} : vector<8x128xf32>, vector<128x512xf32>, vector<8x512xf32> -> vector<8x512xf32>
    %224 = arith.addf %222, %223 : vector<8x512xf32>
    %225 = arith.negf %224 : vector<8x512xf32>
    %226 = math.exp %225 : vector<8x512xf32>
    %cst_71 = arith.constant 1.000000e+00 : f32
    %227 = vector.broadcast %cst_71 : f32 to vector<8x512xf32>
    %228 = arith.addf %227, %226 : vector<8x512xf32>
    %229 = arith.divf %227, %228 : vector<8x512xf32>
    %230 = math.tanh %224 : vector<8x512xf32>
    %231 = vector.extract_strided_slice %229 {offsets = [0, 0], sizes = [8, 128], strides = [1, 1]} : vector<8x512xf32> to vector<8x128xf32>
    %232 = vector.extract_strided_slice %229 {offsets = [0, 128], sizes = [8, 128], strides = [1, 1]} : vector<8x512xf32> to vector<8x128xf32>
    %233 = vector.extract_strided_slice %230 {offsets = [0, 256], sizes = [8, 128], strides = [1, 1]} : vector<8x512xf32> to vector<8x128xf32>
    %234 = vector.extract_strided_slice %229 {offsets = [0, 384], sizes = [8, 128], strides = [1, 1]} : vector<8x512xf32> to vector<8x128xf32>
    %235 = arith.mulf %204, %231 : vector<8x128xf32>
    %236 = arith.mulf %232, %233 : vector<8x128xf32>
    %237 = arith.addf %235, %236 : vector<8x128xf32>
    %238 = math.tanh %237 : vector<8x128xf32>
    %239 = arith.mulf %238, %234 : vector<8x128xf32>
    %240 = vector.extract_strided_slice %239 {offsets = [0, 0], sizes = [8, 64], strides = [1, 1]} : vector<8x128xf32> to vector<8x64xf32>
    %241 = arith.index_cast %215 : i32 to index
    %c0_72 = arith.constant 0 : index
    %242 = vector.load %arg6[%241, %c0_72] : memref<64x128xf32, #tpu.memory_space<vmem>>, vector<8x64xf32>
    tpu.vector_store %arg6[%241, %c0_72], %240 {strides = array<i32>} : memref<64x128xf32, #tpu.memory_space<vmem>>, vector<8x64xf32>,
    %243 = vector.extract_strided_slice %239 {offsets = [0, 64], sizes = [8, 64], strides = [1, 1]} : vector<8x128xf32> to vector<8x64xf32>
    %244 = arith.index_cast %217 : i32 to index
    %c64_73 = arith.constant 64 : index
    %245 = vector.load %arg6[%244, %c64_73] : memref<64x128xf32, #tpu.memory_space<vmem>>, vector<8x64xf32>
    tpu.vector_store %arg6[%244, %c64_73], %243 {strides = array<i32>} : memref<64x128xf32, #tpu.memory_space<vmem>>, vector<8x64xf32>,
    %c7_i32_74 = arith.constant 7 : i32
    %c7_i32_75 = arith.constant 7 : i32
    %246 = arith.subi %c7_i32_75, %c7_i32_74 : i32
    %c8_i32_76 = arith.constant 8 : i32
    %247 = arith.muli %c7_i32_74, %c8_i32_76 : i32
    %248 = tpu.assume_multiple %247, 8 : i32
    %c8_i32_77 = arith.constant 8 : i32
    %249 = arith.muli %246, %c8_i32_77 : i32
    %250 = tpu.assume_multiple %249, 8 : i32
    %251 = arith.index_cast %248 : i32 to index
    %c0_78 = arith.constant 0 : index
    %252 = vector.load %arg7[%251, %c0_78] : memref<64x1024xf32, #tpu.memory_space<vmem>>, vector<8x512xf32>
    %253 = arith.index_cast %250 : i32 to index
    %c512_79 = arith.constant 512 : index
    %254 = vector.load %arg7[%253, %c512_79] : memref<64x1024xf32, #tpu.memory_space<vmem>>, vector<8x512xf32>
    %255 = arith.addf %252, %254 : vector<8x512xf32>
    %cst_80 = arith.constant dense<0.000000e+00> : vector<8x512xf32>
    %256 = tpu.matmul %239, %13, %cst_80 {dimension_numbers = #tpu.dot_dimension_numbers<[1], [0], [0], [1], [0, 0, 1, 1], [], []>} : vector<8x128xf32>, vector<128x512xf32>, vector<8x512xf32> -> vector<8x512xf32>
    %257 = arith.addf %255, %256 : vector<8x512xf32>
    %258 = arith.negf %257 : vector<8x512xf32>
    %259 = math.exp %258 : vector<8x512xf32>
    %cst_81 = arith.constant 1.000000e+00 : f32
    %260 = vector.broadcast %cst_81 : f32 to vector<8x512xf32>
    %261 = arith.addf %260, %259 : vector<8x512xf32>
    %262 = arith.divf %260, %261 : vector<8x512xf32>
    %263 = math.tanh %257 : vector<8x512xf32>
    %264 = vector.extract_strided_slice %262 {offsets = [0, 0], sizes = [8, 128], strides = [1, 1]} : vector<8x512xf32> to vector<8x128xf32>
    %265 = vector.extract_strided_slice %262 {offsets = [0, 128], sizes = [8, 128], strides = [1, 1]} : vector<8x512xf32> to vector<8x128xf32>
    %266 = vector.extract_strided_slice %263 {offsets = [0, 256], sizes = [8, 128], strides = [1, 1]} : vector<8x512xf32> to vector<8x128xf32>
    %267 = vector.extract_strided_slice %262 {offsets = [0, 384], sizes = [8, 128], strides = [1, 1]} : vector<8x512xf32> to vector<8x128xf32>
    %268 = arith.mulf %237, %264 : vector<8x128xf32>
    %269 = arith.mulf %265, %266 : vector<8x128xf32>
    %270 = arith.addf %268, %269 : vector<8x128xf32>
    %271 = math.tanh %270 : vector<8x128xf32>
    %272 = arith.mulf %271, %267 : vector<8x128xf32>
    %273 = vector.extract_strided_slice %272 {offsets = [0, 0], sizes = [8, 64], strides = [1, 1]} : vector<8x128xf32> to vector<8x64xf32>
    %274 = arith.index_cast %248 : i32 to index
    %c0_82 = arith.constant 0 : index
    %275 = vector.load %arg6[%274, %c0_82] : memref<64x128xf32, #tpu.memory_space<vmem>>, vector<8x64xf32>
    tpu.vector_store %arg6[%274, %c0_82], %273 {strides = array<i32>} : memref<64x128xf32, #tpu.memory_space<vmem>>, vector<8x64xf32>,
    %276 = vector.extract_strided_slice %272 {offsets = [0, 64], sizes = [8, 64], strides = [1, 1]} : vector<8x128xf32> to vector<8x64xf32>
    %277 = arith.index_cast %250 : i32 to index
    %c64_83 = arith.constant 64 : index
    %278 = vector.load %arg6[%277, %c64_83] : memref<64x128xf32, #tpu.memory_space<vmem>>, vector<8x64xf32>
    tpu.vector_store %arg6[%277, %c64_83], %276 {strides = array<i32>} : memref<64x128xf32, #tpu.memory_space<vmem>>, vector<8x64xf32>,
    %c8_i32_84 = arith.constant 8 : i32
    %cst_85 = arith.constant 0.000000e+00 : f32
    %279 = vector.broadcast %cst_85 : f32 to vector<8x64xf32>
    %c56 = arith.constant 56 : index
    %c0_86 = arith.constant 0 : index
    %280 = vector.load %arg6[%c56, %c0_86] : memref<64x128xf32, #tpu.memory_space<vmem>>, vector<8x64xf32>
    tpu.vector_store %arg6[%c56, %c0_86], %279 {strides = array<i32>} : memref<64x128xf32, #tpu.memory_space<vmem>>, vector<8x64xf32>,
    %cst_87 = arith.constant 0.000000e+00 : f32
    %281 = vector.broadcast %cst_87 : f32 to vector<8x64xf32>
    %c0_88 = arith.constant 0 : index
    %c64_89 = arith.constant 64 : index
    %282 = vector.load %arg6[%c0_88, %c64_89] : memref<64x128xf32, #tpu.memory_space<vmem>>, vector<8x64xf32>
    tpu.vector_store %arg6[%c0_88, %c64_89], %281 {strides = array<i32>} : memref<64x128xf32, #tpu.memory_space<vmem>>, vector<8x64xf32>,
    %c0_90 = arith.constant 0 : index
    %c0_91 = arith.constant 0 : index
    %283 = vector.load %arg6[%c0_90, %c0_91] : memref<64x128xf32, #tpu.memory_space<vmem>>, vector<64x128xf32>
    %c0_92 = arith.constant 0 : index
    %c0_93 = arith.constant 0 : index
    %284 = vector.load %arg5[%c0_92, %c0_93] : memref<64x128xf32, #tpu.memory_space<vmem>>, vector<64x128xf32>
    tpu.vector_store %arg5[%c0_92, %c0_93], %283 {strides = array<i32>} : memref<64x128xf32, #tpu.memory_space<vmem>>, vector<64x128xf32>,
    return
  }
  func.func @transform_0(%arg0: i32) -> (i32, i32) {
    %c0_i32 = arith.constant 0 : i32
    %c0_i32_0 = arith.constant 0 : i32
    %c0_i32_1 = arith.constant 0 : i32
    return %c0_i32, %c0_i32_0 : i32, i32
  }
  func.func @transform_1(%arg0: i32) -> (i32, i32, i32) {
    %c0_i32 = arith.constant 0 : i32
    %c0_i32_0 = arith.constant 0 : i32
    %c0_i32_1 = arith.constant 0 : i32
    return %arg0, %c0_i32, %c0_i32_0 : i32, i32, i32
  }
  func.func @transform_2(%arg0: i32) -> (i32, i32, i32) {
    %c0_i32 = arith.constant 0 : i32
    %c0_i32_0 = arith.constant 0 : i32
    %c0_i32_1 = arith.constant 0 : i32
    return %arg0, %c0_i32, %c0_i32_0 : i32, i32, i32
  }
  func.func @transform_3(%arg0: i32) -> (i32, i32, i32) {
    %c0_i32 = arith.constant 0 : i32
    %c0_i32_0 = arith.constant 0 : i32
    %c0_i32_1 = arith.constant 0 : i32
    return %arg0, %c0_i32, %c0_i32_0 : i32, i32, i32
  }
  func.func @transform_4(%arg0: i32) -> (i32, i32) {
    %c0_i32 = arith.constant 0 : i32
    %c0_i32_0 = arith.constant 0 : i32
    %c0_i32_1 = arith.constant 0 : i32
    return %c0_i32, %c0_i32_0 : i32, i32
  }
}

</mosaic_0001>

<bundles_post_ra>
// kernel: bilstm_forward.1
= control target key start
LH: loop header
LB: loop body
LE: loop exit
PB: predicated region body
PF: predicated region fallthrough
CT: control target
= control target key end

     0   :  { %9 = vsyncpa [#allocation5], 0  ;;  %s4667_s0 = inlined_call_operand.vmem [shape: f32[64,128], index: 0, kind: input, shape index: {}]   ;;  %s4668_s1 = inlined_call_operand.hbm [shape: f32[2,128,1024], index: 1, kind: input, shape index: {}]   ;;  %s4669_s2 = inlined_call_operand.vmem [shape: f32[2,1,1024], index: 2, kind: input, shape index: {}]   ;;  %s4670_s3 = inlined_call_operand.hbm [shape: f32[2,128,512], index: 3, kind: input, shape index: {}]   ;;  %s4671_s4 = inlined_call_operand.vmem [shape: f32[64,128], index: 4, kind: output, shape index: {}]  }
   0x1   :  { %11 = vsyncpa [#allocation5 + $0x1], 0 }
   0x2   :  { %12 = vsyncpa [#allocation7], 0 }
   0x3   :  { %14 = vsyncpa [#allocation7 + $0x1], 0  ;;  %s3761_s15 = smov 0   ;;  %s3763_s16 = smov 0  }
   0x4   :  { %s3765_s17 = smov 0   ;;  %s3767_s18 = smov 0  }
   0x5 LB: > { %s3780_s19 = sadd.s32 4294967295, %s3727_s18   ;;  %s3783_s20 = sadd.s32 1, %s3727_s18   ;;  %s3727_s18 = sphi %s3767_s18, %s4681_s18   ;;  %s3723_s17 = sphi %s3765_s17, %s4680_s17   ;;  %s3719_s16 = sphi %s3763_s16, %s4679_s16   ;;  %s3715_s15 = sphi %s3761_s15, %s4678_s15  }
   0x6   : > { %s45_s21 = ssub.s32 %s3727_s18, %s3783_s20  ;;  %s48_s22 = sadd.s32 1, %s3723_s17 }
   0x7   : > { %p46_p0 = scmp.eq.s32.totalorder %s45_s21, 0  ;;  %p55_p1 = scmp.ne.s32.totalorder %s3723_s17, %s3719_s16 }
   0x8   : > { %p56_p2 = scmp.eq.s32.totalorder %s3727_s18, 0  ;;  %p61_p3 = scmp.ne.s32.totalorder %s3719_s16, %s3715_s15 }
   0x9   : > { %s3793_s23 = scalar_select %p46_p0, %s3723_s17, %s48_s22  }
   0xa   : > { %p57_p4 = por %p56_p2, %p55_p1  ;;  %p62_p5 = scmp.eq.s32.totalorder %s3780_s19, 0 }
   0xb   : > { %p3463_p6 = scmp.lt.s32.totalorder %s3727_s18, 2  ;;  %s3802_s25 = sand.u32 1, %s3723_s17  }
   0xc   : > { %p3797_p7 = por %p62_p5, %p61_p3  ;;  %s2645_s26 = sshll.u32 %s3802_s25, 10 }
   0xd   : > { %s2682_s27 = sshll.u32 %s3727_s18, 14  ;;  %s165_s5 = scalar_lea.vmem [#allocation4], %s2645_s26 }
   0xe   : > { %s4673_s24 = scalar_select %p3797_p7, 1, 0 }
   0xf   : > { %s3809_s30 = scalar_lea.hbm %s4668_s1, %s2682_s27  ;;  %s172_s6 = sshll.u32 %s165_s5, 4  ;;  %s3811_s6 = int_to_ptr.vmem [resolvable:$true] %s172_s6 }
  0x10   : > { %p3813_p8 = pnand %p3463_p6, %p57_p4  ;;  %s162_s8 = scalar_lea.sflag [#allocation5], %s3802_s25 }
  0x11   : > { %s3629_s9 = scalar_lea.hbm %s3809_s30, 16384  ;;  %s3634_s12 = scalar_lea.hbm %s4668_s1, 32768 }
  0x12   : > { %p3630_p10 = scmp.ne.s32.totalorder %s3809_s30, %s3629_s9  ;;  %p3631_p11 = pneg %p3813_p8 }
  0x13   : > { %p3635_p0 = scmp.lt.u32.totalorder %s3809_s30, %s4668_s1  ;;  %p3636_p1 = scmp.lt.u32.totalorder %s3634_s12, %s3629_s9 }
  0x14   : > { %p3632_p12 = pnand %p3631_p11, %p3630_p10  ;;  %p3638_p3 = scmp.lt.u32.totalorder %s3629_s9, %s3809_s30 }
  0x15   : > { %p3637_p2 = por %p3636_p1, %p3635_p0 }
  0x16   : > { %p3633_p13 = pneg %p3632_p12 }
  0x17   : > { %p3639_p4 = por %p3638_p3, %p3637_p2 }
  0x19   : > { %p3640_p5 = pnand %p3639_p4, %p3633_p13 }
  0x1b   : > { %3643 = shalt.err (!%p3640_p5)
}
  0x1c   : > { %s3644_s15 = scalar_lea.vmem %s3811_s6, 16384  ;;  %s3729_s21 = smov [#allocation4]  }
  0x1d   : > { %p3645_p6 = scmp.ne.s32.totalorder %s3811_s6, %s3644_s15  ;;  %s3649_s22 = sshll.u32 %s3729_s21, 4  ;;  %s3650_s22 = int_to_ptr.vmem [resolvable:$false] %s3649_s22 }
  0x1e   : > { %s3651_s26 = scalar_lea.vmem %s3650_s22, 32768  ;;  %p3652_p9 = scmp.lt.s32.totalorder %s3811_s6, %s3650_s22 }
  0x1f   : > { %p3647_p10 = pnand %p3645_p6, %p3631_p11  ;;  %p3653_p0 = scmp.lt.s32.totalorder %s3651_s26, %s3644_s15 }
  0x21   : > { %p3648_p12 = pneg %p3647_p10  ;;  %p3654_p1 = por %p3653_p0, %p3652_p9 }
  0x23   : > { %p3655_p2 = pnand %p3654_p1, %p3648_p12 }
  0x25   : > { %3658 = shalt.err (!%p3655_p2)
}
  0x26   : > { %s3730_s27 = smov 1024   ;;  %s3731_s28 = smov 64  }
  0x27   : > { %3459 = dma.hbm_to_vmem [thread:$0]  (!%p3813_p8), %s3809_s30, 16384, %s3811_s6, %s162_s8, %s3730_s27, %s3730_s27, %s3731_s28  }
  0x28   : > { %p208_p13 = scmp.lt.s32.totalorder %s3727_s18, 3  ;;  %s2648_s29 = sshll.u32 %s3802_s25, 9 }
  0x29   : > { %s2683_s5 = sshll.u32 %s3727_s18, 13  ;;  %p4675_p9 = scmp.ge.s32.totalorder %s3727_s18, 1 }
  0x2a   : > { %s3858_s12 = scalar_lea.hbm %s4670_s3, %s2683_s5  ;;  %s193_s13 = scalar_lea.vmem [#allocation6], %s2648_s29 }
  0x2b   : > { %p3851_p3 = pnand %p4675_p9, %p208_p13  ;;  %s200_s14 = sshll.u32 %s193_s13, 4  ;;  %s3860_s14 = int_to_ptr.vmem [resolvable:$true] %s200_s14 }
  0x2c   : > { %s190_s30 = scalar_lea.sflag [#allocation7], %s3802_s25  ;;  %s3659_s6 = scalar_lea.hbm %s3858_s12, 8192 }
  0x2d   : > { %p3660_p4 = scmp.ne.s32.totalorder %s3858_s12, %s3659_s6  ;;  %s3664_s15 = scalar_lea.hbm %s4670_s3, 16384 }
  0x2e   : > { %p3665_p10 = scmp.lt.u32.totalorder %s3858_s12, %s4670_s3  ;;  %p3666_p12 = scmp.lt.u32.totalorder %s3664_s15, %s3659_s6 }
  0x2f   : > { %p3662_p5 = pnand %p3660_p4, %p3631_p11  ;;  %p3668_p1 = scmp.lt.u32.totalorder %s3659_s6, %s3858_s12 }
  0x30   : > { %p3667_p0 = por %p3666_p12, %p3665_p10 }
  0x31   : > { %p3663_p6 = pneg %p3662_p5 }
  0x32   : > { %p3669_p2 = por %p3668_p1, %p3667_p0 }
  0x34   : > { %p3670_p13 = pnand %p3669_p2, %p3663_p6 }
  0x36   : > { %3673 = shalt.err (!%p3670_p13)
}
  0x37   : > { %s3674_s26 = scalar_lea.vmem %s3860_s14, 8192  ;;  %s3732_s27 = smov [#allocation6]  }
  0x38   : > { %p3675_p9 = scmp.ne.s32.totalorder %s3860_s14, %s3674_s26  ;;  %s3679_s28 = sshll.u32 %s3732_s27, 4  ;;  %s3680_s28 = int_to_ptr.vmem [resolvable:$false] %s3679_s28 }
  0x39   : > { %s3681_s29 = scalar_lea.vmem %s3680_s28, 16384  ;;  %p3682_p7 = scmp.lt.s32.totalorder %s3860_s14, %s3680_s28 }
  0x3a   : > { %p3677_p4 = pnand %p3675_p9, %p3631_p11  ;;  %p3683_p10 = scmp.lt.s32.totalorder %s3681_s29, %s3674_s26 }
  0x3c   : > { %p3678_p5 = pneg %p3677_p4  ;;  %p3684_p12 = por %p3683_p10, %p3682_p7 }
  0x3e   : > { %p3685_p0 = pnand %p3684_p12, %p3678_p5 }
  0x40   : > { %3688 = shalt.err (!%p3685_p0)
}
  0x41   : > { %s3733_s5 = smov 512   ;;  %s3734_s10 = smov 32  }
  0x42   : > { %3462 = dma.hbm_to_vmem [thread:$0]  (!%p3813_p8), %s3858_s12, 8192, %s3860_s14, %s190_s30, %s3733_s5, %s3733_s5, %s3734_s10  }
  0x43   : > { %212 = sbr.rel (%p3851_p3) target bundleno = 2272 (0x8e0), region = 36  ;;  %s214_s11 = sand.u32 (!%p3851_p3), 1, %s3719_s16  }
  0x44   : > { %s2652_s13 = sshll.u32 (!%p3851_p3), %s214_s11, 10  ;;  %s215_s6 = scalar_lea.sflag (!%p3851_p3), [#allocation5], %s214_s11 }
  0x45   : > { %s3891_s18 = scalar_lea.vmem (!%p3851_p3), [#allocation4], %s2652_s13  ;;  %p4677_p7 = scmp.ne.s32.totalorder (!%p3851_p3), %s4673_s24, 0 }
  0x4a   : > { %3706 = dma.done.wait (%p4677_p7), %s215_s6, 16384  }
  0x4b   : > { %3708 = vsyncadd (%p4677_p7), %s215_s6, 4294950912  ;;  %s2653_s8 = sshll.u32 %s214_s11, 9  ;;  %s224_s7 = scalar_lea.sflag [#allocation7], %s214_s11 }
  0x4c   : > { %s3897_s25 = scalar_lea.vmem [#allocation6], %s2653_s8 }
  0x4d   : > { %3710 = dma.done.wait (%p4677_p7), %s224_s7, 8192  }
  0x4e   : > { %3712 = vsyncadd (%p4677_p7), %s224_s7, 4294959104  ;;  %p256_p8 = scmp.lt.s32.totalorder %s3780_s19, 1  ;;  %p2655_p11 = scmp.ne.s32.totalorder %s3780_s19, 0 }
  0x4f   : > { %v264_v0 = vld [vmem:[%s4667_s0] sm:$0xff] (!%p2655_p11)  ;;  %v265_v1 = vld [vmem:[%s4667_s0 + $0x8] sm:$0xff] (!%p2655_p11)  ;;  %v266_v2 = vld [vmem:[%s4667_s0 + $0x10] sm:$0xff] (!%p2655_p11) }
  0x50   : > { %s257_s9 = scalar_select %p256_p8, %s3780_s19, 1 }
  0x51   : > { %263 = sbr.rel (%p2655_p11) target bundleno = 88 (0x58), region = 48  ;;  %272 = vst [vmem:[#allocation2] sm:$0xff] (!%p2655_p11), %v264_v0  ;;  %273 = vst [vmem:[#allocation2 + $0x8] sm:$0xff] (!%p2655_p11), %v265_v1  ;;  %v267_v3 = vld [vmem:[%s4667_s0 + $0x18] sm:$0xff] (!%p2655_p11)  ;;  %v268_v4 = vld [vmem:[%s4667_s0 + $0x20] sm:$0xff] (!%p2655_p11) }
  0x52   : > { %s2654_s12 = sshll.u32 %s257_s9, 3  ;;  %274 = vst [vmem:[#allocation2 + $0x10] sm:$0xff] (!%p2655_p11), %v266_v2  ;;  %v269_v5 = vld [vmem:[%s4667_s0 + $0x28] sm:$0xff] (!%p2655_p11)  ;;  %275 = vst [vmem:[#allocation2 + $0x18] sm:$0xff] (!%p2655_p11), %v267_v3  ;;  %v270_v6 = vld [vmem:[%s4667_s0 + $0x30] sm:$0xff] (!%p2655_p11) }
  0x53   : > { %s3908_s15 = scalar_lea.vmem %s4669_s2, %s2654_s12  ;;  %276 = vst [vmem:[#allocation2 + $0x20] sm:$0xff] (!%p2655_p11), %v268_v4  ;;  %277 = vst [vmem:[#allocation2 + $0x28] sm:$0xff] (!%p2655_p11), %v269_v5  ;;  %v271_v7 = vld [vmem:[%s4667_s0 + $0x38] sm:$0xff] (!%p2655_p11) }
  0x54   : > { %278 = vst [vmem:[#allocation2 + $0x30] sm:$0xff] (!%p2655_p11), %v270_v6  ;;  %279 = vst [vmem:[#allocation2 + $0x38] sm:$0xff] (!%p2655_p11), %v271_v7 }
  0x58 PF: > { %v289_v8 = vld [vmem:[%s3891_s18 + $0x8] sm:$0xff]  ;;  %v291_v10 = vld [vmem:[%s3891_s18 + $0x18] sm:$0xff]  ;;  %v288_v13 = vld [vmem:[%s3891_s18] sm:$0xff]  ;;  %v3735_v15 = vmov 0.0   ;;  %vm1226_vm0 = vcmask 523264   ;;  %vm1229_vm1 = vcmask 1048064  }
  0x59   : > { %v297_v9 = vld [vmem:[%s3891_s18 + $0x48] sm:$0xff]  ;;  %v299_v12 = vld [vmem:[%s3891_s18 + $0x58] sm:$0xff]  ;;  %v296_v14 = vld [vmem:[%s3891_s18 + $0x40] sm:$0xff]  ;;  %522 = vmatprep.mubr.f32.mxu0 %v3735_v15  ;;  %635 = vmatprep.mubr.f32.mxu1 %v3735_v15 }
  0x5a   : > { %v2684_v11 = vpack.c.bf16 %v297_v9, %v289_v8  ;;  %v2716_v16 = vpack.c.bf16 %v299_v12, %v291_v10  ;;  %v2686_v17 = vpack.c.bf16 %v296_v14, %v288_v13  ;;  %v290_v18 = vld [vmem:[%s3891_s18 + $0x10] sm:$0xff]  ;;  %v305_v20 = vld [vmem:[%s3891_s18 + $0x88] sm:$0xff]  ;;  %v307_v23 = vld [vmem:[%s3891_s18 + $0x98] sm:$0xff] }
  0x5b   : > { %v298_v19 = vld [vmem:[%s3891_s18 + $0x50] sm:$0xff]  ;;  %v313_v22 = vld [vmem:[%s3891_s18 + $0xc8] sm:$0xff]  ;;  %v315_v24 = vld [vmem:[%s3891_s18 + $0xd8] sm:$0xff] }
  0x5c   : > { %2685 = vmatprep.subr.bf16.mxu0 %v2684_v11  ;;  %v2718_v21 = vpack.c.bf16 %v298_v19, %v290_v18  ;;  %2717 = vmatprep.subr.bf16.mxu1 %v2716_v16  ;;  %v2688_v25 = vpack.c.bf16 %v313_v22, %v305_v20  ;;  %v2720_v26 = vpack.c.bf16 %v315_v24, %v307_v23  ;;  %v304_v27 = vld [vmem:[%s3891_s18 + $0x80] sm:$0xff]  ;;  %v306_v29 = vld [vmem:[%s3891_s18 + $0x90] sm:$0xff]  ;;  %v321_v32 = vld [vmem:[%s3891_s18 + $0x108] sm:$0xff] }
  0x5d   : > { %2687 = vmatpush1.bf16.msra.mxu0 %v2686_v17  ;;  %v312_v28 = vld [vmem:[%s3891_s18 + $0xc0] sm:$0xff]  ;;  %v314_v31 = vld [vmem:[%s3891_s18 + $0xd0] sm:$0xff]  ;;  %v329_v33 = vld [vmem:[%s3891_s18 + $0x148] sm:$0xff] }
  0x5e   : > { %2719 = vmatpush1.bf16.msra.mxu1 %v2718_v21  ;;  %v2690_v30 = vpack.c.bf16 %v312_v28, %v304_v27  ;;  %2689 = vmatprep.subr.bf16.mxu0 %v2688_v25  ;;  %v2722_v34 = vpack.c.bf16 %v314_v31, %v306_v29  ;;  %v2692_v35 = vpack.c.bf16 %v329_v33, %v321_v32  ;;  %v323_v36 = vld [vmem:[%s3891_s18 + $0x118] sm:$0xff]  ;;  %v320_v38 = vld [vmem:[%s3891_s18 + $0x100] sm:$0xff]  ;;  %v322_v41 = vld [vmem:[%s3891_s18 + $0x110] sm:$0xff] }
  0x5f   : > { %2721 = vmatprep.subr.bf16.mxu1 %v2720_v26  ;;  %v331_v37 = vld [vmem:[%s3891_s18 + $0x158] sm:$0xff]  ;;  %v328_v40 = vld [vmem:[%s3891_s18 + $0x140] sm:$0xff]  ;;  %v330_v42 = vld [vmem:[%s3891_s18 + $0x150] sm:$0xff] }
  0x60   : > { %v2724_v39 = vpack.c.bf16 %v331_v37, %v323_v36  ;;  %v2694_v43 = vpack.c.bf16 %v328_v40, %v320_v38  ;;  %v337_v44 = vld [vmem:[%s3891_s18 + $0x188] sm:$0xff]  ;;  %v339_v46 = vld [vmem:[%s3891_s18 + $0x198] sm:$0xff]  ;;  %v2726_v47 = vpack.c.bf16 %v330_v42, %v322_v41  ;;  %v336_v50 = vld [vmem:[%s3891_s18 + $0x180] sm:$0xff] }
  0x61   : > { %2691 = vmatpush1.bf16.msra.mxu0 %v2690_v30  ;;  %v345_v45 = vld [vmem:[%s3891_s18 + $0x1c8] sm:$0xff]  ;;  %v347_v49 = vld [vmem:[%s3891_s18 + $0x1d8] sm:$0xff]  ;;  %v344_v51 = vld [vmem:[%s3891_s18 + $0x1c0] sm:$0xff] }
  0x62   : > { %2723 = vmatpush1.bf16.msra.mxu1 %v2722_v34  ;;  %2693 = vmatprep.subr.bf16.mxu0 %v2692_v35  ;;  %v2696_v48 = vpack.c.bf16 %v345_v45, %v337_v44  ;;  %v2728_v52 = vpack.c.bf16 %v347_v49, %v339_v46  ;;  %v338_v53 = vld [vmem:[%s3891_s18 + $0x190] sm:$0xff]  ;;  %v353_v55 = vld [vmem:[%s3891_s18 + $0x208] sm:$0xff]  ;;  %v355_v57 = vld [vmem:[%s3891_s18 + $0x218] sm:$0xff]  ;;  %v2698_v59 = vpack.c.bf16 %v344_v51, %v336_v50 }
  0x63   : > { %2725 = vmatprep.subr.bf16.mxu1 %v2724_v39  ;;  %v346_v54 = vld [vmem:[%s3891_s18 + $0x1d0] sm:$0xff]  ;;  %v361_v56 = vld [vmem:[%s3891_s18 + $0x248] sm:$0xff]  ;;  %v363_v58 = vld [vmem:[%s3891_s18 + $0x258] sm:$0xff] }
  0x64   : > { %v2730_v60 = vpack.c.bf16 %v346_v54, %v338_v53  ;;  %v2700_v61 = vpack.c.bf16 %v361_v56, %v353_v55  ;;  %v352_v62 = vld [vmem:[%s3891_s18 + $0x200] sm:$0xff]  ;;  %v354_v0 = vld [vmem:[%s3891_s18 + $0x210] sm:$0xff]  ;;  %v2732_v1 = vpack.c.bf16 %v363_v58, %v355_v57  ;;  %v369_v3 = vld [vmem:[%s3891_s18 + $0x288] sm:$0xff] }
  0x65   : > { %2695 = vmatpush1.bf16.msra.mxu0 %v2694_v43  ;;  %v360_v63 = vld [vmem:[%s3891_s18 + $0x240] sm:$0xff]  ;;  %v362_v2 = vld [vmem:[%s3891_s18 + $0x250] sm:$0xff]  ;;  %v377_v4 = vld [vmem:[%s3891_s18 + $0x2c8] sm:$0xff] }
  0x66   : > { %2727 = vmatpush1.bf16.msra.mxu1 %v2726_v47  ;;  %2697 = vmatprep.subr.bf16.mxu0 %v2696_v48  ;;  %v371_v5 = vld [vmem:[%s3891_s18 + $0x298] sm:$0xff]  ;;  %v2702_v7 = vpack.c.bf16 %v360_v63, %v352_v62  ;;  %v2734_v8 = vpack.c.bf16 %v362_v2, %v354_v0  ;;  %v2704_v9 = vpack.c.bf16 %v377_v4, %v369_v3  ;;  %v368_v10 = vld [vmem:[%s3891_s18 + $0x280] sm:$0xff]  ;;  %v370_v12 = vld [vmem:[%s3891_s18 + $0x290] sm:$0xff] }
  0x67   : > { %2729 = vmatprep.subr.bf16.mxu1 %v2728_v52  ;;  %v379_v6 = vld [vmem:[%s3891_s18 + $0x2d8] sm:$0xff]  ;;  %v376_v11 = vld [vmem:[%s3891_s18 + $0x2c0] sm:$0xff]  ;;  %v378_v14 = vld [vmem:[%s3891_s18 + $0x2d0] sm:$0xff] }
  0x68   : > { %v2736_v13 = vpack.c.bf16 %v379_v6, %v371_v5  ;;  %v385_v16 = vld [vmem:[%s3891_s18 + $0x308] sm:$0xff]  ;;  %v387_v18 = vld [vmem:[%s3891_s18 + $0x318] sm:$0xff]  ;;  %v2706_v20 = vpack.c.bf16 %v376_v11, %v368_v10  ;;  %v2738_v21 = vpack.c.bf16 %v378_v14, %v370_v12  ;;  %v384_v23 = vld [vmem:[%s3891_s18 + $0x300] sm:$0xff] }
  0x69   : > { %2699 = vmatpush1.bf16.msra.mxu0 %v2698_v59  ;;  %v393_v17 = vld [vmem:[%s3891_s18 + $0x348] sm:$0xff]  ;;  %v395_v19 = vld [vmem:[%s3891_s18 + $0x358] sm:$0xff]  ;;  %v392_v24 = vld [vmem:[%s3891_s18 + $0x340] sm:$0xff] }
  0x6a   : > { %2731 = vmatpush1.bf16.msra.mxu1 %v2730_v60  ;;  %2701 = vmatprep.subr.bf16.mxu0 %v2700_v61  ;;  %v2708_v22 = vpack.c.bf16 %v393_v17, %v385_v16  ;;  %v386_v25 = vld [vmem:[%s3891_s18 + $0x310] sm:$0xff]  ;;  %v2740_v26 = vpack.c.bf16 %v395_v19, %v387_v18  ;;  %v401_v28 = vld [vmem:[%s3891_s18 + $0x388] sm:$0xff]  ;;  %v403_v30 = vld [vmem:[%s3891_s18 + $0x398] sm:$0xff]  ;;  %v2710_v32 = vpack.c.bf16 %v392_v24, %v384_v23 }
  0x6b   : > { %2733 = vmatprep.subr.bf16.mxu1 %v2732_v1  ;;  %v394_v27 = vld [vmem:[%s3891_s18 + $0x350] sm:$0xff]  ;;  %v409_v29 = vld [vmem:[%s3891_s18 + $0x3c8] sm:$0xff]  ;;  %v411_v31 = vld [vmem:[%s3891_s18 + $0x3d8] sm:$0xff] }
  0x6c   : > { %v2742_v33 = vpack.c.bf16 %v394_v27, %v386_v25  ;;  %v2712_v34 = vpack.c.bf16 %v409_v29, %v401_v28  ;;  %v400_v35 = vld [vmem:[%s3891_s18 + $0x380] sm:$0xff]  ;;  %v402_v37 = vld [vmem:[%s3891_s18 + $0x390] sm:$0xff]  ;;  %v2744_v38 = vpack.c.bf16 %v411_v31, %v403_v30  ;;  %v293_v40 = vld [vmem:[%s3891_s18 + $0x28] sm:$0xff] }
  0x6d   : > { %2703 = vmatpush1.bf16.msra.mxu0 %v2702_v7  ;;  %v408_v36 = vld [vmem:[%s3891_s18 + $0x3c0] sm:$0xff]  ;;  %v410_v39 = vld [vmem:[%s3891_s18 + $0x3d0] sm:$0xff]  ;;  %v301_v41 = vld [vmem:[%s3891_s18 + $0x68] sm:$0xff] }
  0x6e   : > { %2735 = vmatpush1.bf16.msra.mxu1 %v2734_v8  ;;  %2705 = vmatprep.subr.bf16.mxu0 %v2704_v9  ;;  %v295_v42 = vld [vmem:[%s3891_s18 + $0x38] sm:$0xff]  ;;  %v2714_v44 = vpack.c.bf16 %v408_v36, %v400_v35  ;;  %v2746_v45 = vpack.c.bf16 %v410_v39, %v402_v37  ;;  %v2748_v46 = vpack.c.bf16 %v301_v41, %v293_v40  ;;  %v292_v47 = vld [vmem:[%s3891_s18 + $0x20] sm:$0xff]  ;;  %v309_v50 = vld [vmem:[%s3891_s18 + $0xa8] sm:$0xff] }
  0x6f   : > { %2737 = vmatprep.subr.bf16.mxu1 %v2736_v13  ;;  %v303_v43 = vld [vmem:[%s3891_s18 + $0x78] sm:$0xff]  ;;  %v300_v48 = vld [vmem:[%s3891_s18 + $0x60] sm:$0xff]  ;;  %v317_v51 = vld [vmem:[%s3891_s18 + $0xe8] sm:$0xff] }
  0x70   : > { %v2780_v49 = vpack.c.bf16 %v303_v43, %v295_v42  ;;  %v294_v52 = vld [vmem:[%s3891_s18 + $0x30] sm:$0xff]  ;;  %v4011_v54 = vld [vmem:[#allocation2] sm:$0xff]  ;;  %v2750_v55 = vpack.c.bf16 %v300_v48, %v292_v47  ;;  %v311_v56 = vld [vmem:[%s3891_s18 + $0xb8] sm:$0xff]  ;;  %v2752_v60 = vpack.c.bf16 %v317_v51, %v309_v50 }
  0x71   : > { %2707 = vmatpush1.bf16.msra.mxu0 %v2706_v20  ;;  %v302_v53 = vld [vmem:[%s3891_s18 + $0x70] sm:$0xff]  ;;  %v319_v57 = vld [vmem:[%s3891_s18 + $0xf8] sm:$0xff]  ;;  %v308_v58 = vld [vmem:[%s3891_s18 + $0xa0] sm:$0xff] }
  0x72   : > { %2739 = vmatpush1.bf16.msra.mxu1 %v2738_v21  ;;  %2709 = vmatprep.subr.bf16.mxu0 %v2708_v22  ;;  %v316_v59 = vld [vmem:[%s3891_s18 + $0xe0] sm:$0xff]  ;;  %v2782_v61 = vpack.c.bf16 %v302_v53, %v294_v52  ;;  %v325_v62 = vld [vmem:[%s3891_s18 + $0x128] sm:$0xff]  ;;  %v2784_v63 = vpack.c.bf16 %v319_v57, %v311_v56  ;;  %v310_v1 = vld [vmem:[%s3891_s18 + $0xb0] sm:$0xff] }
  0x73   : > { %2741 = vmatprep.subr.bf16.mxu1 %v2740_v26  ;;  %v333_v0 = vld [vmem:[%s3891_s18 + $0x168] sm:$0xff]  ;;  %v318_v2 = vld [vmem:[%s3891_s18 + $0xf0] sm:$0xff]  ;;  %v2754_v4 = vpack.c.bf16 %v316_v59, %v308_v58  ;;  %v327_v5 = vld [vmem:[%s3891_s18 + $0x138] sm:$0xff] }
  0x74   : > { %v4023_v3 = vld [vmem:[#allocation2 + $0x8] sm:$0xff]  ;;  %v335_v6 = vld [vmem:[%s3891_s18 + $0x178] sm:$0xff]  ;;  %v324_v7 = vld [vmem:[%s3891_s18 + $0x120] sm:$0xff]  ;;  %v2756_v9 = vpack.c.bf16 %v333_v0, %v325_v62  ;;  %v2786_v10 = vpack.c.bf16 %v318_v2, %v310_v1 }
  0x75   : > { %2711 = vmatpush1.bf16.msra.mxu0 %v2710_v32  ;;  %v332_v8 = vld [vmem:[%s3891_s18 + $0x160] sm:$0xff]  ;;  %v326_v11 = vld [vmem:[%s3891_s18 + $0x130] sm:$0xff]  ;;  %v2788_v12 = vpack.c.bf16 %v335_v6, %v327_v5  ;;  %v341_v14 = vld [vmem:[%s3891_s18 + $0x1a8] sm:$0xff] }
  0x76   : > { %2743 = vmatpush1.bf16.msra.mxu1 %v2742_v33  ;;  %2713 = vmatprep.subr.bf16.mxu0 %v2712_v34  ;;  %v334_v13 = vld [vmem:[%s3891_s18 + $0x170] sm:$0xff]  ;;  %v349_v16 = vld [vmem:[%s3891_s18 + $0x1e8] sm:$0xff]  ;;  %v2758_v18 = vpack.c.bf16 %v332_v8, %v324_v7  ;;  %v343_v19 = vld [vmem:[%s3891_s18 + $0x1b8] sm:$0xff] }
  0x77   : > { %2745 = vmatprep.subr.bf16.mxu1 %v2744_v38  ;;  %v4037_v17 = vld [vmem:[#allocation2 + $0x10] sm:$0xff]  ;;  %v351_v20 = vld [vmem:[%s3891_s18 + $0x1f8] sm:$0xff]  ;;  %v2790_v21 = vpack.c.bf16 %v334_v13, %v326_v11  ;;  %v2760_v22 = vpack.c.bf16 %v349_v16, %v341_v14  ;;  %v340_v23 = vld [vmem:[%s3891_s18 + $0x1a0] sm:$0xff] }
  0x78   : > { %v348_v24 = vld [vmem:[%s3891_s18 + $0x1e0] sm:$0xff]  ;;  %v342_v25 = vld [vmem:[%s3891_s18 + $0x1b0] sm:$0xff]  ;;  %v2792_v26 = vpack.c.bf16 %v351_v20, %v343_v19  ;;  %v357_v28 = vld [vmem:[%s3891_s18 + $0x228] sm:$0xff] }
  0x79   : > { %2715 = vmatpush1.bf16.msra.mxu0 %v2714_v44  ;;  %v350_v27 = vld [vmem:[%s3891_s18 + $0x1f0] sm:$0xff]  ;;  %v365_v29 = vld [vmem:[%s3891_s18 + $0x268] sm:$0xff]  ;;  %v4051_v30 = vld [vmem:[#allocation2 + $0x18] sm:$0xff]  ;;  %v2762_v33 = vpack.c.bf16 %v348_v24, %v340_v23 }
  0x7a   : > { %2747 = vmatpush1.bf16.msra.mxu1 %v2746_v45  ;;  %2749 = vmatprep.subr.bf16.mxu0 %v2748_v46  ;;  %v359_v31 = vld [vmem:[%s3891_s18 + $0x238] sm:$0xff]  ;;  %v2794_v34 = vpack.c.bf16 %v350_v27, %v342_v25  ;;  %v2764_v35 = vpack.c.bf16 %v365_v29, %v357_v28  ;;  %v356_v36 = vld [vmem:[%s3891_s18 + $0x220] sm:$0xff]  ;;  %v358_v38 = vld [vmem:[%s3891_s18 + $0x230] sm:$0xff] }
  0x7b   : > { %2781 = vmatprep.subr.bf16.mxu1 %v2780_v49  ;;  %v367_v32 = vld [vmem:[%s3891_s18 + $0x278] sm:$0xff]  ;;  %v364_v37 = vld [vmem:[%s3891_s18 + $0x260] sm:$0xff]  ;;  %v366_v40 = vld [vmem:[%s3891_s18 + $0x270] sm:$0xff] }
  0x7c   : > { %523 = vmatmul.mubr.f32.vlgmr.msra.gmra.mrb[0].mxu0 %v4011_v54  ;;  %v2796_v39 = vpack.c.bf16 %v367_v32, %v359_v31  ;;  %v373_v41 = vld [vmem:[%s3891_s18 + $0x2a8] sm:$0xff]  ;;  %v4066_v43 = vld [vmem:[#allocation2 + $0x20] sm:$0xff]  ;;  %v375_v44 = vld [vmem:[%s3891_s18 + $0x2b8] sm:$0xff]  ;;  %v2766_v46 = vpack.c.bf16 %v364_v37, %v356_v36  ;;  %v2798_v47 = vpack.c.bf16 %v366_v40, %v358_v38 }
  0x7d   : > { %636 = vmatmul.mubr.f32.vlgmr.msra.gmra.mrb[0].mxu1 %v4011_v54  ;;  %2751 = vmatpush1.bf16.msra.mxu0 %v2750_v55  ;;  %v381_v42 = vld [vmem:[%s3891_s18 + $0x2e8] sm:$0xff]  ;;  %v383_v45 = vld [vmem:[%s3891_s18 + $0x2f8] sm:$0xff]  ;;  %v372_v49 = vld [vmem:[%s3891_s18 + $0x2a0] sm:$0xff] }
  0x7e   : > { %528 = vmatprep.mubr.f32.mxu0 %v3735_v15  ;;  %641 = vmatprep.mubr.f32.mxu1 %v3735_v15  ;;  %v2768_v48 = vpack.c.bf16 %v381_v42, %v373_v41  ;;  %v380_v50 = vld [vmem:[%s3891_s18 + $0x2e0] sm:$0xff]  ;;  %v374_v51 = vld [vmem:[%s3891_s18 + $0x2b0] sm:$0xff]  ;;  %v2800_v52 = vpack.c.bf16 %v383_v45, %v375_v44  ;;  %v389_v55 = vld [vmem:[%s3891_s18 + $0x328] sm:$0xff] }
  0x7f   : > { %2753 = vmatprep.subr.bf16.mxu0 %v2752_v60  ;;  %2783 = vmatpush1.bf16.msra.mxu1 %v2782_v61  ;;  %v382_v53 = vld [vmem:[%s3891_s18 + $0x2f0] sm:$0xff]  ;;  %v397_v56 = vld [vmem:[%s3891_s18 + $0x368] sm:$0xff]  ;;  %v391_v58 = vld [vmem:[%s3891_s18 + $0x338] sm:$0xff]  ;;  %v2770_v60 = vpack.c.bf16 %v380_v50, %v372_v49 }
  0x80   : > { %529 = vmatmul.mubr.f32.gmra.mrb[2].mxu0 %v4023_v3  ;;  %2785 = vmatprep.subr.bf16.mxu1 %v2784_v63  ;;  %v4080_v57 = vld [vmem:[#allocation2 + $0x28] sm:$0xff]  ;;  %v399_v59 = vld [vmem:[%s3891_s18 + $0x378] sm:$0xff]  ;;  %v2802_v61 = vpack.c.bf16 %v382_v53, %v374_v51  ;;  %v2772_v62 = vpack.c.bf16 %v397_v56, %v389_v55  ;;  %v388_v63 = vld [vmem:[%s3891_s18 + $0x320] sm:$0xff] }
  0x81   : > { %642 = vmatmul.mubr.f32.gmra.mrb[2].mxu1 %v4023_v3  ;;  %2755 = vmatpush1.bf16.msra.mxu0 %v2754_v4  ;;  %v396_v0 = vld [vmem:[%s3891_s18 + $0x360] sm:$0xff]  ;;  %v390_v1 = vld [vmem:[%s3891_s18 + $0x330] sm:$0xff]  ;;  %v2804_v2 = vpack.c.bf16 %v399_v59, %v391_v58  ;;  %v405_v5 = vld [vmem:[%s3891_s18 + $0x3a8] sm:$0xff] }
  0x82   : > { %534 = vmatprep.mubr.f32.mxu0 %v3735_v15  ;;  %647 = vmatprep.mubr.f32.mxu1 %v3735_v15  ;;  %v398_v4 = vld [vmem:[%s3891_s18 + $0x370] sm:$0xff]  ;;  %v413_v6 = vld [vmem:[%s3891_s18 + $0x3e8] sm:$0xff]  ;;  %v407_v8 = vld [vmem:[%s3891_s18 + $0x3b8] sm:$0xff] }
  0x83   : > { %2757 = vmatprep.subr.bf16.mxu0 %v2756_v9  ;;  %2787 = vmatpush1.bf16.msra.mxu1 %v2786_v10  ;;  %v4094_v7 = vld [vmem:[#allocation2 + $0x30] sm:$0xff]  ;;  %v415_v9 = vld [vmem:[%s3891_s18 + $0x3f8] sm:$0xff]  ;;  %v2774_v10 = vpack.c.bf16 %v396_v0, %v388_v63  ;;  %v2806_v11 = vpack.c.bf16 %v398_v4, %v390_v1  ;;  %v404_v13 = vld [vmem:[%s3891_s18 + $0x3a0] sm:$0xff] }
  0x84   : > { %535 = vmatmul.mubr.f32.gmra.mrb[4].mxu0 %v4037_v17  ;;  %2789 = vmatprep.subr.bf16.mxu1 %v2788_v12  ;;  %v2776_v12 = vpack.c.bf16 %v413_v6, %v405_v5  ;;  %v412_v14 = vld [vmem:[%s3891_s18 + $0x3e0] sm:$0xff]  ;;  %v406_v16 = vld [vmem:[%s3891_s18 + $0x3b0] sm:$0xff]  ;;  %v975_v20 = vld [vmem:[%s3897_s25 + $0x8] sm:$0xff] }
  0x85   : > { %648 = vmatmul.mubr.f32.gmra.mrb[4].mxu1 %v4037_v17  ;;  %2759 = vmatpush1.bf16.msra.mxu0 %v2758_v18  ;;  %v2808_v18 = vpack.c.bf16 %v415_v9, %v407_v8  ;;  %v414_v19 = vld [vmem:[%s3891_s18 + $0x3f0] sm:$0xff]  ;;  %v977_v23 = vld [vmem:[%s3897_s25 + $0x18] sm:$0xff]  ;;  %v2778_v25 = vpack.c.bf16 %v412_v14, %v404_v13  ;;  %v974_v29 = vld [vmem:[%s3897_s25] sm:$0xff] }
  0x86   : > { %540 = vmatprep.mubr.f32.mxu0 %v3735_v15  ;;  %653 = vmatprep.mubr.f32.mxu1 %v3735_v15  ;;  %v981_v24 = vld [vmem:[%s3897_s25 + $0x38] sm:$0xff]  ;;  %v978_v31 = vld [vmem:[%s3897_s25 + $0x20] sm:$0xff]  ;;  %v983_v32 = vld [vmem:[%s3897_s25 + $0x48] sm:$0xff] }
  0x87   : > { %2791 = vmatpush1.bf16.msra.mxu1 %v2790_v21  ;;  %2761 = vmatprep.subr.bf16.mxu0 %v2760_v22  ;;  %v979_v21 = vld [vmem:[%s3897_s25 + $0x28] sm:$0xff]  ;;  %v4108_v22 = vld [vmem:[#allocation2 + $0x38] sm:$0xff]  ;;  %v4116_v28 = vpack.c.bf16 %v981_v24, %v977_v23  ;;  %v4129_v36 = vpack.c.bf16 %v978_v31, %v974_v29  ;;  %v986_v40 = vld [vmem:[%s3897_s25 + $0x60] sm:$0xff] }
  0x88   : > { %541 = vmatmul.mubr.f32.gmra.mrb[6].mxu0 %v4051_v30  ;;  %2793 = vmatprep.subr.bf16.mxu1 %v2792_v26  ;;  %v2810_v26 = vpack.c.bf16 %v414_v19, %v406_v16  ;;  %v4113_v27 = vpack.c.bf16 %v979_v21, %v975_v20  ;;  %v985_v37 = vld [vmem:[%s3897_s25 + $0x58] sm:$0xff]  ;;  %v991_v44 = vld [vmem:[%s3897_s25 + $0x88] sm:$0xff]  ;;  %v994_v53 = vld [vmem:[%s3897_s25 + $0xa0] sm:$0xff] }
  0x89   : > { %654 = vmatmul.mubr.f32.gmra.mrb[6].mxu1 %v4051_v30  ;;  %546 = vmatprep.mubr.f32.mxu0 %v3735_v15  ;;  %v989_v38 = vld [vmem:[%s3897_s25 + $0x78] sm:$0xff]  ;;  %v992_v56 = vld [vmem:[%s3897_s25 + $0x90] sm:$0xff]  ;;  %v1002_v4 = vld [vmem:[%s3897_s25 + $0xe0] sm:$0xff] }
  0x8a   : > { %659 = vmatprep.mubr.f32.mxu1 %v3735_v15  ;;  %2763 = vmatpush1.bf16.msra.mxu0 %v2762_v33  ;;  %v987_v33 = vld [vmem:[%s3897_s25 + $0x68] sm:$0xff]  ;;  %v4141_v45 = vpack.c.bf16 %v989_v38, %v985_v37  ;;  %v993_v50 = vld [vmem:[%s3897_s25 + $0x98] sm:$0xff]  ;;  %v996_v59 = vld [vmem:[%s3897_s25 + $0xb0] sm:$0xff] }
  0x8b   : > { %2795 = vmatpush1.bf16.msra.mxu1 %v2794_v34  ;;  %2765 = vmatprep.subr.bf16.mxu0 %v2764_v35  ;;  %v976_v34 = vld [vmem:[%s3897_s25 + $0x10] sm:$0xff]  ;;  %v4135_v41 = vpack.c.bf16 %v987_v33, %v983_v32  ;;  %v997_v51 = vld [vmem:[%s3897_s25 + $0xb8] sm:$0xff]  ;;  %v1007_v9 = vld [vmem:[%s3897_s25 + $0x108] sm:$0xff] }
  0x8c   : > { %547 = vmatmul.mubr.f32.gmra.mrb[8].mxu0 %v4066_v43  ;;  %2797 = vmatprep.subr.bf16.mxu1 %v2796_v39  ;;  %v980_v35 = vld [vmem:[%s3897_s25 + $0x30] sm:$0xff]  ;;  %v982_v39 = vld [vmem:[%s3897_s25 + $0x40] sm:$0xff]  ;;  %v4165_v58 = vpack.c.bf16 %v997_v51, %v993_v50  ;;  %v1001_v63 = vld [vmem:[%s3897_s25 + $0xd8] sm:$0xff] }
  0x8d   : > { %660 = vmatmul.mubr.f32.gmra.mrb[8].mxu1 %v4066_v43  ;;  %552 = vmatprep.mubr.f32.mxu0 %v3735_v15  ;;  %v4137_v42 = vpack.c.bf16 %v980_v35, %v976_v34  ;;  %v4148_v49 = vpack.c.bf16 %v986_v40, %v982_v39  ;;  %v1005_v0 = vld [vmem:[%s3897_s25 + $0xf8] sm:$0xff]  ;;  %v1000_v5 = vld [vmem:[%s3897_s25 + $0xd0] sm:$0xff]  ;;  %v1006_v16 = vld [vmem:[%s3897_s25 + $0x100] sm:$0xff] }
  0x8e   : > { %665 = vmatprep.mubr.f32.mxu1 %v3735_v15  ;;  %2767 = vmatpush1.bf16.msra.mxu0 %v2766_v46  ;;  %v995_v46 = vld [vmem:[%s3897_s25 + $0xa8] sm:$0xff]  ;;  %v4189_v6 = vpack.c.bf16 %v1005_v0, %v1001_v63  ;;  %v1004_v8 = vld [vmem:[%s3897_s25 + $0xf0] sm:$0xff]  ;;  %v1014_v32 = vld [vmem:[%s3897_s25 + $0x140] sm:$0xff] }
  0x8f   : > { %2799 = vmatpush1.bf16.msra.mxu1 %v2798_v47  ;;  %2769 = vmatprep.subr.bf16.mxu0 %v2768_v48  ;;  %v984_v47 = vld [vmem:[%s3897_s25 + $0x50] sm:$0xff]  ;;  %v1015_v23 = vld [vmem:[%s3897_s25 + $0x148] sm:$0xff]  ;;  %v1018_v33 = vld [vmem:[%s3897_s25 + $0x160] sm:$0xff] }
  0x90   : > { %553 = vmatmul.mubr.f32.gmra.mrb[10].mxu0 %v4080_v57  ;;  %2801 = vmatprep.subr.bf16.mxu1 %v2800_v52  ;;  %v988_v48 = vld [vmem:[%s3897_s25 + $0x70] sm:$0xff]  ;;  %v990_v52 = vld [vmem:[%s3897_s25 + $0x80] sm:$0xff]  ;;  %v1019_v24 = vld [vmem:[%s3897_s25 + $0x168] sm:$0xff] }
  0x91   : > { %666 = vmatmul.mubr.f32.gmra.mrb[10].mxu1 %v4080_v57  ;;  %558 = vmatprep.mubr.f32.mxu0 %v3735_v15  ;;  %v4160_v55 = vpack.c.bf16 %v988_v48, %v984_v47  ;;  %v1008_v19 = vld [vmem:[%s3897_s25 + $0x110] sm:$0xff]  ;;  %v4230_v31 = vpack.c.bf16 %v1019_v24, %v1015_v23  ;;  %v1023_v38 = vld [vmem:[%s3897_s25 + $0x188] sm:$0xff]  ;;  %v1025_v40 = vld [vmem:[%s3897_s25 + $0x198] sm:$0xff] }
  0x92   : > { %671 = vmatprep.mubr.f32.mxu1 %v3735_v15  ;;  %2771 = vmatpush1.bf16.msra.mxu0 %v2770_v60  ;;  %v999_v60 = vld [vmem:[%s3897_s25 + $0xc8] sm:$0xff]  ;;  %v1012_v21 = vld [vmem:[%s3897_s25 + $0x130] sm:$0xff]  ;;  %v1022_v48 = vld [vmem:[%s3897_s25 + $0x180] sm:$0xff] }
  0x93   : > { %2803 = vmatpush1.bf16.msra.mxu1 %v2802_v61  ;;  %2773 = vmatprep.subr.bf16.mxu0 %v2772_v62  ;;  %v1003_v61 = vld [vmem:[%s3897_s25 + $0xe8] sm:$0xff]  ;;  %v4172_v62 = vpack.c.bf16 %v994_v53, %v990_v52  ;;  %v1016_v34 = vld [vmem:[%s3897_s25 + $0x150] sm:$0xff]  ;;  %v1026_v50 = vld [vmem:[%s3897_s25 + $0x1a0] sm:$0xff] }
  0x94   : > { %559 = vmatmul.mubr.f32.gmra.mrb[12].mxu0 %v4094_v7  ;;  %2805 = vmatprep.subr.bf16.mxu1 %v2804_v2  ;;  %v4182_v1 = vpack.c.bf16 %v1003_v61, %v999_v60  ;;  %v998_v2 = vld [vmem:[%s3897_s25 + $0xc0] sm:$0xff]  ;;  %v1020_v37 = vld [vmem:[%s3897_s25 + $0x170] sm:$0xff]  ;;  %v1027_v39 = vld [vmem:[%s3897_s25 + $0x1a8] sm:$0xff]  ;;  %v4272_v63 = vpack.c.bf16 %v1026_v50, %v1022_v48 }
  0x95   : > { %672 = vmatmul.mubr.f32.gmra.mrb[12].mxu1 %v4094_v7  ;;  %564 = vmatprep.mubr.f32.mxu0 %v3735_v15  ;;  %v4200_v13 = vpack.c.bf16 %v1002_v4, %v998_v2  ;;  %v4254_v47 = vpack.c.bf16 %v1027_v39, %v1023_v38  ;;  %v1024_v51 = vld [vmem:[%s3897_s25 + $0x190] sm:$0xff]  ;;  %v1033_v60 = vld [vmem:[%s3897_s25 + $0x1d8] sm:$0xff]  ;;  %v1034_v4 = vld [vmem:[%s3897_s25 + $0x1e0] sm:$0xff] }
  0x96   : > { %677 = vmatprep.mubr.f32.mxu1 %v3735_v15  ;;  %2775 = vmatpush1.bf16.msra.mxu0 %v2774_v10  ;;  %v1011_v10 = vld [vmem:[%s3897_s25 + $0x128] sm:$0xff]  ;;  %v1028_v53 = vld [vmem:[%s3897_s25 + $0x1b0] sm:$0xff]  ;;  %v1037_v61 = vld [vmem:[%s3897_s25 + $0x1f8] sm:$0xff] }
  0x97   : > { %2807 = vmatpush1.bf16.msra.mxu1 %v2806_v11  ;;  %2777 = vmatprep.subr.bf16.mxu0 %v2776_v12  ;;  %v1009_v11 = vld [vmem:[%s3897_s25 + $0x118] sm:$0xff]  ;;  %v4206_v14 = vpack.c.bf16 %v1011_v10, %v1007_v9  ;;  %v4276_v0 = vpack.c.bf16 %v1028_v53, %v1024_v51  ;;  %v1036_v9 = vld [vmem:[%s3897_s25 + $0x1f0] sm:$0xff] }
  0x98   : > { %565 = vmatmul.mubr.f32.gmra.mrb[14].mxu0 %v4108_v22  ;;  %2809 = vmatprep.subr.bf16.mxu1 %v2808_v18  ;;  %v1013_v12 = vld [vmem:[%s3897_s25 + $0x138] sm:$0xff]  ;;  %v1010_v18 = vld [vmem:[%s3897_s25 + $0x120] sm:$0xff] }
  0x99   : > { %678 = vmatmul.mubr.f32.gmra.mrb[14].mxu1 %v4108_v22  ;;  %748 = vmatprep.mubr.f32.mxu0 %v3735_v15  ;;  %v4213_v20 = vpack.c.bf16 %v1013_v12, %v1009_v11  ;;  %v4224_v29 = vpack.c.bf16 %v1010_v18, %v1006_v16  ;;  %v416_v18 = vld [vmem:[%s3908_s15] sm:$0xff] }
  0x9a   : > { %2779 = vmatpush1.bf16.msra.mxu0 %v2778_v25  ;;  %861 = vmatprep.mubr.f32.mxu1 %v3735_v15  ;;  %v1017_v25 = vld [vmem:[%s3897_s25 + $0x158] sm:$0xff] }
  0x9b   : > { %2811 = vmatpush1.bf16.msra.mxu1 %v2810_v26  ;;  %2813 = vmatprep.subr.bf16.mxu0 %v4113_v27  ;;  %v1021_v26 = vld [vmem:[%s3897_s25 + $0x178] sm:$0xff] }
  0x9c   : > { %2845 = vmatprep.subr.bf16.mxu1 %v4116_v28  ;;  %v4237_v35 = vpack.c.bf16 %v1021_v26, %v1017_v25 }
  0xa0   : > { %749 = vmatmul.mubr.f32.vlgmr.msra.gmra.mrb[14].mxu0 %v4011_v54 }
  0xa1   : > { %862 = vmatmul.mubr.f32.vlgmr.msra.gmra.mrb[14].mxu1 %v4011_v54  ;;  %2815 = vmatpush1.bf16.msra.mxu0 %v4129_v36  ;;  %v4158_v54 = vpack.c.bf16 %v995_v46, %v991_v44  ;;  %v1029_v44 = vld [vmem:[%s3897_s25 + $0x1b8] sm:$0xff]  ;;  %v4248_v46 = vpack.c.bf16 %v1018_v33, %v1014_v32 }
  0xa2   : > { %754 = vmatprep.mubr.f32.mxu0 %v3735_v15  ;;  %867 = vmatprep.mubr.f32.mxu1 %v3735_v15  ;;  %v4261_v52 = vpack.c.bf16 %v1029_v44, %v1025_v40 }
  0xa3   : > { %2817 = vmatprep.subr.bf16.mxu0 %v4135_v41  ;;  %2847 = vmatpush1.bf16.msra.mxu1 %v4137_v42 }
  0xa4   : > { %755 = vmatmul.mubr.f32.gmra.mrb[12].mxu0 %v4023_v3  ;;  %2849 = vmatprep.subr.bf16.mxu1 %v4141_v45 }
  0xa5   : > { %868 = vmatmul.mubr.f32.gmra.mrb[12].mxu1 %v4023_v3  ;;  %2819 = vmatpush1.bf16.msra.mxu0 %v4148_v49  ;;  %v4180_v3 = vpack.c.bf16 %v996_v59, %v992_v56  ;;  %v1031_v56 = vld [vmem:[%s3897_s25 + $0x1c8] sm:$0xff] }
  0xa6   : > { %760 = vmatprep.mubr.f32.mxu0 %v3735_v15  ;;  %873 = vmatprep.mubr.f32.mxu1 %v3735_v15  ;;  %v1035_v59 = vld [vmem:[%s3897_s25 + $0x1e8] sm:$0xff] }
  0xa7   : > { %2821 = vmatprep.subr.bf16.mxu0 %v4158_v54  ;;  %2851 = vmatpush1.bf16.msra.mxu1 %v4160_v55  ;;  %v4278_v2 = vpack.c.bf16 %v1035_v59, %v1031_v56 }
  0xa8   : > { %761 = vmatmul.mubr.f32.gmra.mrb[10].mxu0 %v4037_v17  ;;  %2853 = vmatprep.subr.bf16.mxu1 %v4165_v58 }
  0xa9   : > { %874 = vmatmul.mubr.f32.gmra.mrb[10].mxu1 %v4037_v17  ;;  %2823 = vmatpush1.bf16.msra.mxu0 %v4172_v62  ;;  %v4204_v17 = vpack.c.bf16 %v1004_v8, %v1000_v5  ;;  %v4284_v5 = vpack.c.bf16 %v1037_v61, %v1033_v60  ;;  %v1032_v8 = vld [vmem:[%s3897_s25 + $0x1d0] sm:$0xff] }
  0xaa   : > { %766 = vmatprep.mubr.f32.mxu0 %v3735_v15  ;;  %879 = vmatprep.mubr.f32.mxu1 %v3735_v15  ;;  %v4296_v11 = vpack.c.bf16 %v1036_v9, %v1032_v8 }
  0xab   : > { %2855 = vmatpush1.bf16.msra.mxu1 %v4180_v3  ;;  %2825 = vmatprep.subr.bf16.mxu0 %v4182_v1 }
  0xac   : > { %767 = vmatmul.mubr.f32.gmra.mrb[8].mxu0 %v4051_v30  ;;  %2857 = vmatprep.subr.bf16.mxu1 %v4189_v6 }
  0xad   : > { %880 = vmatmul.mubr.f32.gmra.mrb[8].mxu1 %v4051_v30  ;;  %772 = vmatprep.mubr.f32.mxu0 %v3735_v15  ;;  %v4228_v30 = vpack.c.bf16 %v1012_v21, %v1008_v19 }
  0xae   : > { %885 = vmatprep.mubr.f32.mxu1 %v3735_v15  ;;  %2827 = vmatpush1.bf16.msra.mxu0 %v4200_v13 }
  0xaf   : > { %2859 = vmatpush1.bf16.msra.mxu1 %v4204_v17  ;;  %2829 = vmatprep.subr.bf16.mxu0 %v4206_v14 }
  0xb0   : > { %773 = vmatmul.mubr.f32.gmra.mrb[6].mxu0 %v4066_v43  ;;  %2861 = vmatprep.subr.bf16.mxu1 %v4213_v20 }
  0xb1   : > { %886 = vmatmul.mubr.f32.gmra.mrb[6].mxu1 %v4066_v43  ;;  %778 = vmatprep.mubr.f32.mxu0 %v3735_v15  ;;  %v4252_v43 = vpack.c.bf16 %v1020_v37, %v1016_v34 }
  0xb2   : > { %891 = vmatprep.mubr.f32.mxu1 %v3735_v15  ;;  %2831 = vmatpush1.bf16.msra.mxu0 %v4224_v29 }
  0xb3   : > { %2863 = vmatpush1.bf16.msra.mxu1 %v4228_v30  ;;  %2833 = vmatprep.subr.bf16.mxu0 %v4230_v31 }
  0xb4   : > { %779 = vmatmul.mubr.f32.gmra.mrb[4].mxu0 %v4080_v57  ;;  %2865 = vmatprep.subr.bf16.mxu1 %v4237_v35 }
  0xb5   : > { %892 = vmatmul.mubr.f32.gmra.mrb[4].mxu1 %v4080_v57  ;;  %784 = vmatprep.mubr.f32.mxu0 %v3735_v15  ;;  %v1030_v57 = vld [vmem:[%s3897_s25 + $0x1c0] sm:$0xff] }
  0xb6   : > { %897 = vmatprep.mubr.f32.mxu1 %v3735_v15  ;;  %2835 = vmatpush1.bf16.msra.mxu0 %v4248_v46  ;;  %v4292_v10 = vpack.c.bf16 %v1034_v4, %v1030_v57 }
  0xb7   : > { %2867 = vmatpush1.bf16.msra.mxu1 %v4252_v43  ;;  %2837 = vmatprep.subr.bf16.mxu0 %v4254_v47 }
  0xb8   : > { %785 = vmatmul.mubr.f32.gmra.mrb[2].mxu0 %v4094_v7  ;;  %2869 = vmatprep.subr.bf16.mxu1 %v4261_v52 }
  0xb9   : > { %898 = vmatmul.mubr.f32.gmra.mrb[2].mxu1 %v4094_v7  ;;  %790 = vmatprep.mubr.f32.mxu0 %v3735_v15  ;;  %v418_v7 = vlaneseq }
  0xba   : > { %903 = vmatprep.mubr.f32.mxu1 %v3735_v15  ;;  %2839 = vmatpush1.bf16.msra.mxu0 %v4272_v63 }
  0xbb   : > { %2871 = vmatpush1.bf16.msra.mxu1 %v4276_v0  ;;  %2841 = vmatprep.subr.bf16.mxu0 %v4278_v2 }
  0xbc   : > { %791 = vmatmul.mubr.f32.gmra.mrb[0].mxu0 %v4108_v22  ;;  %2873 = vmatprep.subr.bf16.mxu1 %v4284_v5 }
  0xbd   : > { %904 = vmatmul.mubr.f32.gmra.mrb[0].mxu1 %v4108_v22  ;;  %1120 = vmatprep.mubr.f32.mxu0 %v3735_v15  ;;  %v419_v22 = vshrl.u32 %v418_v7, 7 }
  0xbe   : > { %2843 = vmatpush1.bf16.msra.mxu0 %v4292_v10  ;;  %1191 = vmatprep.mubr.f32.mxu1 %v3735_v15 }
  0xbf   : > { %2875 = vmatpush1.bf16.msra.mxu1 %v4296_v11  ;;  %2877 = vmatprep.subr.bf16.mxu0 %v4113_v27  ;;  %v420_v12 = vsub.s32 0, %v419_v22  ;;  %v436_v16 = vsub.s32 4, %v419_v22  ;;  %v424_v19 = vsub.s32 1, %v419_v22  ;;  %v440_v21 = vsub.s32 5, %v419_v22 }
  0xc0   : > { %2909 = vmatprep.subr.bf16.mxu1 %v4116_v28  ;;  %v432_v32 = vsub.s32 3, %v419_v22  ;;  %v448_v33 = vsub.s32 7, %v419_v22  ;;  %v428_v48 = vsub.s32 2, %v419_v22  ;;  %v444_v50 = vsub.s32 6, %v419_v22 }
  0xc1   : > { %v421_v23 = vrot.slane %v416_v18, %v420_v12  ;;  %v437_v24 = vrot.slane %v416_v18, %v436_v16  ;;  %v425_v25 = vrot.slane %v416_v18, %v424_v19  ;;  %v441_v26 = vrot.slane %v416_v18, %v440_v21 }
  0xc2   : > { %v433_v39 = vrot.slane %v416_v18, %v432_v32  ;;  %v449_v40 = vrot.slane %v416_v18, %v448_v33  ;;  %v429_v4 = vrot.slane %v416_v18, %v428_v48  ;;  %v445_v8 = vrot.slane %v416_v18, %v444_v50 }
  0xc3   : > { %v4344_v34 = vadd.f32 %v437_v24, %v421_v23  ;;  %v4346_v37 = vadd.f32 %v441_v26, %v425_v25 }
  0xc4   : > { %1121 = vmatmul.mubr.f32.vlgmr.msra.gmra.mrb[0].mxu0 %v3735_v15  ;;  %v4350_v57 = vadd.f32 %v449_v40, %v433_v39  ;;  %v4353_v7 = vadd.f32 %v445_v8, %v429_v4 }
  0xc5   : > { %1192 = vmatmul.mubr.f32.vlgmr.msra.gmra.mrb[0].mxu1 %v3735_v15  ;;  %2879 = vmatpush1.bf16.msra.mxu0 %v4129_v36 }
  0xc6   : > { %2911 = vmatpush1.bf16.msra.mxu1 %v4137_v42  ;;  %2881 = vmatprep.subr.bf16.mxu0 %v4135_v41 }
  0xc7   : > { %2913 = vmatprep.subr.bf16.mxu1 %v4141_v45  ;;  %1313 = vmatprep.mubr.f32.mxu0 %v3735_v15 }
  0xc8   : > { %1384 = vmatprep.mubr.f32.mxu1 %v3735_v15 }
  0xc9   : > { %2883 = vmatpush1.bf16.msra.mxu0 %v4148_v49 }
  0xca   : > { %2915 = vmatpush1.bf16.msra.mxu1 %v4160_v55  ;;  %2885 = vmatprep.subr.bf16.mxu0 %v4158_v54 }
  0xcb   : > { %2917 = vmatprep.subr.bf16.mxu1 %v4165_v58 }
  0xcd   : > { %2887 = vmatpush1.bf16.msra.mxu0 %v4172_v62 }
  0xce   : > { %2919 = vmatpush1.bf16.msra.mxu1 %v4180_v3  ;;  %2889 = vmatprep.subr.bf16.mxu0 %v4182_v1 }
  0xcf   : > { %2921 = vmatprep.subr.bf16.mxu1 %v4189_v6 }
  0xd1   : > { %2891 = vmatpush1.bf16.msra.mxu0 %v4200_v13 }
  0xd2   : > { %2923 = vmatpush1.bf16.msra.mxu1 %v4204_v17  ;;  %2893 = vmatprep.subr.bf16.mxu0 %v4206_v14 }
  0xd3   : > { %2925 = vmatprep.subr.bf16.mxu1 %v4213_v20 }
  0xd5   : > { %2895 = vmatpush1.bf16.msra.mxu0 %v4224_v29 }
  0xd6   : > { %2927 = vmatpush1.bf16.msra.mxu1 %v4228_v30  ;;  %2897 = vmatprep.subr.bf16.mxu0 %v4230_v31 }
  0xd7   : > { %2929 = vmatprep.subr.bf16.mxu1 %v4237_v35 }
  0xd9   : > { %2899 = vmatpush1.bf16.msra.mxu0 %v4248_v46 }
  0xda   : > { %2931 = vmatpush1.bf16.msra.mxu1 %v4252_v43  ;;  %2901 = vmatprep.subr.bf16.mxu0 %v4254_v47 }
  0xdb   : > { %2933 = vmatprep.subr.bf16.mxu1 %v4261_v52 }
  0xdd   : > { %2903 = vmatpush1.bf16.msra.mxu0 %v4272_v63 }
  0xde   : > { %2935 = vmatpush1.bf16.msra.mxu1 %v4276_v0  ;;  %2905 = vmatprep.subr.bf16.mxu0 %v4278_v2 }
  0xdf   : > { %2937 = vmatprep.subr.bf16.mxu1 %v4284_v5 }
  0xe1   : > { %2907 = vmatpush1.bf16.msra.mxu0 %v4292_v10 }
  0xe2   : > { %2939 = vmatpush1.bf16.msra.mxu1 %v4296_v11  ;;  %2941 = vmatprep.subr.bf16.mxu0 %v4113_v27 }
  0xe3   : > { %2973 = vmatprep.subr.bf16.mxu1 %v4116_v28 }
 0x197   : > { %v1122_v38 = vpop.f32.mrb[0].mxu0 }
 0x198   : > { %v3325_v44 = vadd.f32 %v4344_v34, %v1122_v38  ;;  %v1193_v51 = vpop.f32.mrb[0].mxu1  ;;  %v1124_v53 = vpop.f32.mrb[1].mxu0 }
 0x199   : > { %v3327_v56 = vadd.f32 %v4346_v37, %v1124_v53  ;;  %v1195_v59 = vpop.f32.mrb[1].mxu1  ;;  %v3357_v22 = vadd.f32 %v4353_v7, %v1193_v51 }
 0x19a   : > { %v2656_v60 = vmul.f32 -1.442695, %v3325_v44  ;;  %v3359_v9 = vadd.f32 %v4350_v57, %v1195_v59 }
 0x19b   : > { %v2657_v61 = vmul.f32 -1.442695, %v3327_v56 }
 0x19c   : > { %3501 = vpow2.f32 %v2656_v60  ;;  %v2658_v12 = vmul.f32 -1.442695, %v3359_v9 }
 0x19d   : > { %3503 = vpow2.f32 %v2657_v61 }
 0x19e   : > { %3505 = vpow2.f32 %v2658_v12 }
 0x19f   : > { %3507 = vtanh.f32 %v3357_v22 }
 0x1a6   : > { %v3502_v16 = vpop.eup %3501 }
 0x1a7   : > { %v3504_v19 = vpop.eup %3503  ;;  %v1211_v21 = vadd.f32 1.0, %v3502_v16 }
 0x1a8   : > { %v1212_v23 = vadd.f32 1.0, %v3504_v19  ;;  %v3506_v24 = vpop.eup %3505 }
 0x1a9   : > { %3509 = vrcp.f32 %v1211_v21  ;;  %v3508_v25 = vpop.eup %3507  ;;  %v1213_v33 = vadd.f32 1.0, %v3506_v24 }
 0x1aa   : > { %3511 = vrcp.f32 %v1212_v23 }
 0x1ab   : > { %3513 = vrcp.f32 %v1213_v33 }
 0x1b3   : > { %v3510_v26 = vpop.eup %3509 }
 0x1b4   : > { %v3512_v18 = vpop.eup %3511  ;;  %v1221_v32 = vmul.f32 0.0, %v3510_v26 }
 0x1b5   : > { %v1222_v38 = vmul.f32 %v3512_v18, %v3508_v25  ;;  %v3514_v40 = vpop.eup %3513 }
 0x1b7   : > { %v4356_v39 = vadd.f32 %v1222_v38, %v1221_v32 }
 0x1b9   : > { %3515 = vtanh.f32 %v4356_v39 }
 0x1c3   : > { %v3516_v44 = vpop.eup %3515 }
 0x1c4   : > { %v1225_v48 = vmul.f32 %v3516_v44, %v3514_v40 }
 0x1c6   : > { %1227 = vst.msk [vmem:[#allocation2] sm:$0xff] %vm1226_vm0, %v1225_v48  ;;  %1314 = vmatmul.mubr.f32.vlgmr.msra.gmra.mrb[2].mxu0 %v1225_v48  ;;  %1385 = vmatmul.mubr.f32.vlgmr.msra.gmra.mrb[2].mxu1 %v1225_v48 }
 0x1c7   : > { %1230 = vst.msk [vmem:[#allocation2 + $0x38] sm:$0xff] %vm1229_vm1, %v1225_v48  ;;  %2943 = vmatpush1.bf16.msra.mxu0 %v4129_v36  ;;  %2975 = vmatpush1.bf16.msra.mxu1 %v4137_v42 }
 0x1c8   : > { %2945 = vmatprep.subr.bf16.mxu0 %v4135_v41  ;;  %2977 = vmatprep.subr.bf16.mxu1 %v4141_v45 }
 0x1c9   : > { %1505 = vmatprep.mubr.f32.mxu0 %v3735_v15  ;;  %1576 = vmatprep.mubr.f32.mxu1 %v3735_v15 }
 0x1cb   : > { %2947 = vmatpush1.bf16.msra.mxu0 %v4148_v49  ;;  %2979 = vmatpush1.bf16.msra.mxu1 %v4160_v55 }
 0x1cc   : > { %2949 = vmatprep.subr.bf16.mxu0 %v4158_v54  ;;  %2981 = vmatprep.subr.bf16.mxu1 %v4165_v58 }
 0x1cf   : > { %2951 = vmatpush1.bf16.msra.mxu0 %v4172_v62  ;;  %2983 = vmatpush1.bf16.msra.mxu1 %v4180_v3 }
 0x1d0   : > { %2953 = vmatprep.subr.bf16.mxu0 %v4182_v1  ;;  %2985 = vmatprep.subr.bf16.mxu1 %v4189_v6 }
 0x1d3   : > { %2955 = vmatpush1.bf16.msra.mxu0 %v4200_v13  ;;  %2987 = vmatpush1.bf16.msra.mxu1 %v4204_v17 }
 0x1d4   : > { %2957 = vmatprep.subr.bf16.mxu0 %v4206_v14  ;;  %2989 = vmatprep.subr.bf16.mxu1 %v4213_v20 }
 0x1d7   : > { %2959 = vmatpush1.bf16.msra.mxu0 %v4224_v29  ;;  %2991 = vmatpush1.bf16.msra.mxu1 %v4228_v30 }
 0x1d8   : > { %2961 = vmatprep.subr.bf16.mxu0 %v4230_v31  ;;  %2993 = vmatprep.subr.bf16.mxu1 %v4237_v35 }
 0x1db   : > { %2963 = vmatpush1.bf16.msra.mxu0 %v4248_v46  ;;  %2995 = vmatpush1.bf16.msra.mxu1 %v4252_v43 }
 0x1dc   : > { %2965 = vmatprep.subr.bf16.mxu0 %v4254_v47  ;;  %2997 = vmatprep.subr.bf16.mxu1 %v4261_v52 }
 0x1df   : > { %2967 = vmatpush1.bf16.msra.mxu0 %v4272_v63  ;;  %2999 = vmatpush1.bf16.msra.mxu1 %v4276_v0 }
 0x1e0   : > { %2969 = vmatprep.subr.bf16.mxu0 %v4278_v2  ;;  %3001 = vmatprep.subr.bf16.mxu1 %v4284_v5 }
 0x1e3   : > { %2971 = vmatpush1.bf16.msra.mxu0 %v4292_v10  ;;  %3003 = vmatpush1.bf16.msra.mxu1 %v4296_v11 }
 0x1e4   : > { %3005 = vmatprep.subr.bf16.mxu0 %v4113_v27  ;;  %3037 = vmatprep.subr.bf16.mxu1 %v4116_v28 }
 0x299   : > { %v1315_v50 = vpop.f32.mrb[2].mxu0  ;;  %v1386_v51 = vpop.f32.mrb[2].mxu1 }
 0x29a   : > { %v3329_v53 = vadd.f32 %v4344_v34, %v1315_v50  ;;  %v1317_v56 = vpop.f32.mrb[3].mxu0  ;;  %v1388_v59 = vpop.f32.mrb[3].mxu1  ;;  %v3361_v12 = vadd.f32 %v4353_v7, %v1386_v51 }
 0x29b   : > { %v3331_v60 = vadd.f32 %v4346_v37, %v1317_v56  ;;  %v3363_v8 = vadd.f32 %v4350_v57, %v1388_v59 }
 0x29c   : > { %v2659_v61 = vmul.f32 -1.442695, %v3329_v53 }
 0x29d   : > { %v2660_v4 = vmul.f32 -1.442695, %v3331_v60  ;;  %v2661_v9 = vmul.f32 -1.442695, %v3363_v8 }
 0x29e   : > { %3517 = vpow2.f32 %v2659_v61 }
 0x29f   : > { %3519 = vpow2.f32 %v2660_v4 }
 0x2a0   : > { %3521 = vpow2.f32 %v2661_v9 }
 0x2a1   : > { %3523 = vtanh.f32 %v3361_v12 }
 0x2a8   : > { %v3518_v22 = vpop.eup %3517 }
 0x2a9   : > { %v3520_v16 = vpop.eup %3519  ;;  %v1404_v19 = vadd.f32 1.0, %v3518_v22 }
 0x2aa   : > { %v1405_v21 = vadd.f32 1.0, %v3520_v16  ;;  %v3522_v23 = vpop.eup %3521 }
 0x2ab   : > { %3525 = vrcp.f32 %v1404_v19  ;;  %v3524_v24 = vpop.eup %3523  ;;  %v1406_v32 = vadd.f32 1.0, %v3522_v23 }
 0x2ac   : > { %3527 = vrcp.f32 %v1405_v21 }
 0x2ad   : > { %3529 = vrcp.f32 %v1406_v32 }
 0x2b5   : > { %v3526_v25 = vpop.eup %3525 }
 0x2b6   : > { %v3528_v26 = vpop.eup %3527  ;;  %v1414_v18 = vmul.f32 %v3526_v25, %v4356_v39 }
 0x2b7   : > { %v1415_v33 = vmul.f32 %v3528_v26, %v3524_v24  ;;  %v3530_v40 = vpop.eup %3529 }
 0x2b9   : > { %v4400_v38 = vadd.f32 %v1415_v33, %v1414_v18 }
 0x2bb   : > { %3531 = vtanh.f32 %v4400_v38 }
 0x2c5   : > { %v3532_v44 = vpop.eup %3531 }
 0x2c6   : > { %v1418_v48 = vmul.f32 %v3532_v44, %v3530_v40 }
 0x2c8   : > { %1420 = vst.msk [vmem:[#allocation2 + $0x8] sm:$0xff] %vm1226_vm0, %v1418_v48  ;;  %1506 = vmatmul.mubr.f32.vlgmr.msra.gmra.mrb[4].mxu0 %v1418_v48  ;;  %1577 = vmatmul.mubr.f32.vlgmr.msra.gmra.mrb[4].mxu1 %v1418_v48 }
 0x2c9   : > { %1422 = vst.msk [vmem:[#allocation2 + $0x30] sm:$0xff] %vm1229_vm1, %v1418_v48  ;;  %3007 = vmatpush1.bf16.msra.mxu0 %v4129_v36  ;;  %3039 = vmatpush1.bf16.msra.mxu1 %v4137_v42 }
 0x2ca   : > { %3009 = vmatprep.subr.bf16.mxu0 %v4135_v41  ;;  %3041 = vmatprep.subr.bf16.mxu1 %v4141_v45 }
 0x2cb   : > { %1697 = vmatprep.mubr.f32.mxu0 %v3735_v15  ;;  %1768 = vmatprep.mubr.f32.mxu1 %v3735_v15 }
 0x2cd   : > { %3011 = vmatpush1.bf16.msra.mxu0 %v4148_v49  ;;  %3043 = vmatpush1.bf16.msra.mxu1 %v4160_v55 }
 0x2ce   : > { %3013 = vmatprep.subr.bf16.mxu0 %v4158_v54  ;;  %3045 = vmatprep.subr.bf16.mxu1 %v4165_v58 }
 0x2d1   : > { %3015 = vmatpush1.bf16.msra.mxu0 %v4172_v62  ;;  %3047 = vmatpush1.bf16.msra.mxu1 %v4180_v3 }
 0x2d2   : > { %3017 = vmatprep.subr.bf16.mxu0 %v4182_v1  ;;  %3049 = vmatprep.subr.bf16.mxu1 %v4189_v6 }
 0x2d5   : > { %3019 = vmatpush1.bf16.msra.mxu0 %v4200_v13  ;;  %3051 = vmatpush1.bf16.msra.mxu1 %v4204_v17 }
 0x2d6   : > { %3021 = vmatprep.subr.bf16.mxu0 %v4206_v14  ;;  %3053 = vmatprep.subr.bf16.mxu1 %v4213_v20 }
 0x2d9   : > { %3023 = vmatpush1.bf16.msra.mxu0 %v4224_v29  ;;  %3055 = vmatpush1.bf16.msra.mxu1 %v4228_v30 }
 0x2da   : > { %3025 = vmatprep.subr.bf16.mxu0 %v4230_v31  ;;  %3057 = vmatprep.subr.bf16.mxu1 %v4237_v35 }
 0x2dd   : > { %3027 = vmatpush1.bf16.msra.mxu0 %v4248_v46  ;;  %3059 = vmatpush1.bf16.msra.mxu1 %v4252_v43 }
 0x2de   : > { %3029 = vmatprep.subr.bf16.mxu0 %v4254_v47  ;;  %3061 = vmatprep.subr.bf16.mxu1 %v4261_v52 }
 0x2e1   : > { %3031 = vmatpush1.bf16.msra.mxu0 %v4272_v63  ;;  %3063 = vmatpush1.bf16.msra.mxu1 %v4276_v0 }
 0x2e2   : > { %3033 = vmatprep.subr.bf16.mxu0 %v4278_v2  ;;  %3065 = vmatprep.subr.bf16.mxu1 %v4284_v5 }
 0x2e5   : > { %3035 = vmatpush1.bf16.msra.mxu0 %v4292_v10  ;;  %3067 = vmatpush1.bf16.msra.mxu1 %v4296_v11 }
 0x2e6   : > { %3069 = vmatprep.subr.bf16.mxu0 %v4113_v27  ;;  %3101 = vmatprep.subr.bf16.mxu1 %v4116_v28 }
 0x39b   : > { %v1507_v39 = vpop.f32.mrb[4].mxu0  ;;  %v1578_v50 = vpop.f32.mrb[4].mxu1 }
 0x39c   : > { %v3333_v51 = vadd.f32 %v4344_v34, %v1507_v39  ;;  %v1509_v53 = vpop.f32.mrb[5].mxu0  ;;  %v1580_v56 = vpop.f32.mrb[5].mxu1  ;;  %v3365_v9 = vadd.f32 %v4353_v7, %v1578_v50 }
 0x39d   : > { %v3335_v59 = vadd.f32 %v4346_v37, %v1509_v53  ;;  %v3367_v4 = vadd.f32 %v4350_v57, %v1580_v56 }
 0x39e   : > { %v2662_v60 = vmul.f32 -1.442695, %v3333_v51 }
 0x39f   : > { %v2663_v61 = vmul.f32 -1.442695, %v3335_v59  ;;  %v2664_v8 = vmul.f32 -1.442695, %v3367_v4 }
 0x3a0   : > { %3533 = vpow2.f32 %v2662_v60 }
 0x3a1   : > { %3535 = vpow2.f32 %v2663_v61 }
 0x3a2   : > { %3537 = vpow2.f32 %v2664_v8 }
 0x3a3   : > { %3539 = vtanh.f32 %v3365_v9 }
 0x3aa   : > { %v3534_v12 = vpop.eup %3533 }
 0x3ab   : > { %v3536_v22 = vpop.eup %3535  ;;  %v1596_v16 = vadd.f32 1.0, %v3534_v12 }
 0x3ac   : > { %v1597_v19 = vadd.f32 1.0, %v3536_v22  ;;  %v3538_v21 = vpop.eup %3537 }
 0x3ad   : > { %3541 = vrcp.f32 %v1596_v16  ;;  %v3540_v23 = vpop.eup %3539  ;;  %v1598_v18 = vadd.f32 1.0, %v3538_v21 }
 0x3ae   : > { %3543 = vrcp.f32 %v1597_v19 }
 0x3af   : > { %3545 = vrcp.f32 %v1598_v18 }
 0x3b7   : > { %v3542_v24 = vpop.eup %3541 }
 0x3b8   : > { %v3544_v25 = vpop.eup %3543  ;;  %v1606_v26 = vmul.f32 %v3542_v24, %v4400_v38 }
 0x3b9   : > { %v1607_v32 = vmul.f32 %v3544_v25, %v3540_v23  ;;  %v3546_v40 = vpop.eup %3545 }
 0x3bb   : > { %v4444_v33 = vadd.f32 %v1607_v32, %v1606_v26 }
 0x3bd   : > { %3547 = vtanh.f32 %v4444_v33 }
 0x3c7   : > { %v3548_v44 = vpop.eup %3547 }
 0x3c8   : > { %v1610_v48 = vmul.f32 %v3548_v44, %v3546_v40 }
 0x3ca   : > { %1612 = vst.msk [vmem:[#allocation2 + $0x10] sm:$0xff] %vm1226_vm0, %v1610_v48  ;;  %1698 = vmatmul.mubr.f32.vlgmr.msra.gmra.mrb[6].mxu0 %v1610_v48  ;;  %1769 = vmatmul.mubr.f32.vlgmr.msra.gmra.mrb[6].mxu1 %v1610_v48 }
 0x3cb   : > { %1614 = vst.msk [vmem:[#allocation2 + $0x28] sm:$0xff] %vm1229_vm1, %v1610_v48  ;;  %3071 = vmatpush1.bf16.msra.mxu0 %v4129_v36  ;;  %3103 = vmatpush1.bf16.msra.mxu1 %v4137_v42 }
 0x3cc   : > { %3073 = vmatprep.subr.bf16.mxu0 %v4135_v41  ;;  %3105 = vmatprep.subr.bf16.mxu1 %v4141_v45 }
 0x3cd   : > { %1883 = vmatprep.mubr.f32.mxu0 %v3735_v15  ;;  %1954 = vmatprep.mubr.f32.mxu1 %v3735_v15 }
 0x3cf   : > { %3075 = vmatpush1.bf16.msra.mxu0 %v4148_v49  ;;  %3107 = vmatpush1.bf16.msra.mxu1 %v4160_v55 }
 0x3d0   : > { %3077 = vmatprep.subr.bf16.mxu0 %v4158_v54  ;;  %3109 = vmatprep.subr.bf16.mxu1 %v4165_v58 }
 0x3d3   : > { %3079 = vmatpush1.bf16.msra.mxu0 %v4172_v62  ;;  %3111 = vmatpush1.bf16.msra.mxu1 %v4180_v3 }
 0x3d4   : > { %3081 = vmatprep.subr.bf16.mxu0 %v4182_v1  ;;  %3113 = vmatprep.subr.bf16.mxu1 %v4189_v6 }
 0x3d7   : > { %3083 = vmatpush1.bf16.msra.mxu0 %v4200_v13  ;;  %3115 = vmatpush1.bf16.msra.mxu1 %v4204_v17 }
 0x3d8   : > { %3085 = vmatprep.subr.bf16.mxu0 %v4206_v14  ;;  %3117 = vmatprep.subr.bf16.mxu1 %v4213_v20 }
 0x3db   : > { %3087 = vmatpush1.bf16.msra.mxu0 %v4224_v29  ;;  %3119 = vmatpush1.bf16.msra.mxu1 %v4228_v30 }
 0x3dc   : > { %3089 = vmatprep.subr.bf16.mxu0 %v4230_v31  ;;  %3121 = vmatprep.subr.bf16.mxu1 %v4237_v35 }
 0x3df   : > { %3091 = vmatpush1.bf16.msra.mxu0 %v4248_v46  ;;  %3123 = vmatpush1.bf16.msra.mxu1 %v4252_v43 }
 0x3e0   : > { %3093 = vmatprep.subr.bf16.mxu0 %v4254_v47  ;;  %3125 = vmatprep.subr.bf16.mxu1 %v4261_v52 }
 0x3e3   : > { %3095 = vmatpush1.bf16.msra.mxu0 %v4272_v63  ;;  %3127 = vmatpush1.bf16.msra.mxu1 %v4276_v0 }
 0x3e4   : > { %3097 = vmatprep.subr.bf16.mxu0 %v4278_v2  ;;  %3129 = vmatprep.subr.bf16.mxu1 %v4284_v5 }
 0x3e7   : > { %3099 = vmatpush1.bf16.msra.mxu0 %v4292_v10  ;;  %3131 = vmatpush1.bf16.msra.mxu1 %v4296_v11 }
 0x3e8   : > { %3133 = vmatprep.subr.bf16.mxu0 %v4113_v27  ;;  %3165 = vmatprep.subr.bf16.mxu1 %v4116_v28 }
 0x49d   : > { %v1699_v38 = vpop.f32.mrb[6].mxu0  ;;  %v1770_v39 = vpop.f32.mrb[6].mxu1 }
 0x49e   : > { %v3337_v50 = vadd.f32 %v4344_v34, %v1699_v38  ;;  %v1701_v51 = vpop.f32.mrb[7].mxu0  ;;  %v1772_v53 = vpop.f32.mrb[7].mxu1  ;;  %v3369_v8 = vadd.f32 %v4353_v7, %v1770_v39 }
 0x49f   : > { %v3339_v56 = vadd.f32 %v4346_v37, %v1701_v51  ;;  %v3371_v61 = vadd.f32 %v4350_v57, %v1772_v53 }
 0x4a0   : > { %v2665_v59 = vmul.f32 -1.442695, %v3337_v50 }
 0x4a1   : > { %v2666_v60 = vmul.f32 -1.442695, %v3339_v56  ;;  %v2667_v4 = vmul.f32 -1.442695, %v3371_v61 }
 0x4a2   : > { %3549 = vpow2.f32 %v2665_v59 }
 0x4a3   : > { %3551 = vpow2.f32 %v2666_v60 }
 0x4a4   : > { %3553 = vpow2.f32 %v2667_v4 }
 0x4a5   : > { %3555 = vtanh.f32 %v3369_v8 }
 0x4ac   : > { %v3550_v9 = vpop.eup %3549 }
 0x4ad   : > { %v3552_v12 = vpop.eup %3551  ;;  %v1788_v22 = vadd.f32 1.0, %v3550_v9 }
 0x4ae   : > { %v1789_v16 = vadd.f32 1.0, %v3552_v12  ;;  %v3554_v19 = vpop.eup %3553 }
 0x4af   : > { %3557 = vrcp.f32 %v1788_v22  ;;  %v3556_v21 = vpop.eup %3555  ;;  %v1790_v26 = vadd.f32 1.0, %v3554_v19 }
 0x4b0   : > { %3559 = vrcp.f32 %v1789_v16 }
 0x4b1   : > { %3561 = vrcp.f32 %v1790_v26 }
 0x4b9   : > { %v3558_v23 = vpop.eup %3557 }
 0x4ba   : > { %v3560_v24 = vpop.eup %3559  ;;  %v1798_v25 = vmul.f32 %v3558_v23, %v4444_v33 }
 0x4bb   : > { %v1799_v18 = vmul.f32 %v3560_v24, %v3556_v21  ;;  %v3562_v40 = vpop.eup %3561 }
 0x4bd   : > { %v4488_v32 = vadd.f32 %v1799_v18, %v1798_v25 }
 0x4bf   : > { %3563 = vtanh.f32 %v4488_v32 }
 0x4c9   : > { %v3564_v44 = vpop.eup %3563 }
 0x4ca   : > { %v1802_v48 = vmul.f32 %v3564_v44, %v3562_v40 }
 0x4cc   : > { %1804 = vst.msk [vmem:[#allocation2 + $0x18] sm:$0xff] %vm1226_vm0, %v1802_v48  ;;  %1884 = vmatmul.mubr.f32.vlgmr.msra.gmra.mrb[8].mxu0 %v1802_v48  ;;  %1955 = vmatmul.mubr.f32.vlgmr.msra.gmra.mrb[8].mxu1 %v1802_v48 }
 0x4cd   : > { %1806 = vst.msk [vmem:[#allocation2 + $0x20] sm:$0xff] %vm1229_vm1, %v1802_v48  ;;  %3135 = vmatpush1.bf16.msra.mxu0 %v4129_v36  ;;  %3167 = vmatpush1.bf16.msra.mxu1 %v4137_v42 }
 0x4ce   : > { %3137 = vmatprep.subr.bf16.mxu0 %v4135_v41  ;;  %3169 = vmatprep.subr.bf16.mxu1 %v4141_v45 }
 0x4cf   : > { %2067 = vmatprep.mubr.f32.mxu0 %v3735_v15  ;;  %2138 = vmatprep.mubr.f32.mxu1 %v3735_v15 }
 0x4d1   : > { %3139 = vmatpush1.bf16.msra.mxu0 %v4148_v49  ;;  %3171 = vmatpush1.bf16.msra.mxu1 %v4160_v55 }
 0x4d2   : > { %3141 = vmatprep.subr.bf16.mxu0 %v4158_v54  ;;  %3173 = vmatprep.subr.bf16.mxu1 %v4165_v58 }
 0x4d5   : > { %3143 = vmatpush1.bf16.msra.mxu0 %v4172_v62  ;;  %3175 = vmatpush1.bf16.msra.mxu1 %v4180_v3 }
 0x4d6   : > { %3145 = vmatprep.subr.bf16.mxu0 %v4182_v1  ;;  %3177 = vmatprep.subr.bf16.mxu1 %v4189_v6 }
 0x4d9   : > { %3147 = vmatpush1.bf16.msra.mxu0 %v4200_v13  ;;  %3179 = vmatpush1.bf16.msra.mxu1 %v4204_v17 }
 0x4da   : > { %3149 = vmatprep.subr.bf16.mxu0 %v4206_v14  ;;  %3181 = vmatprep.subr.bf16.mxu1 %v4213_v20 }
 0x4dd   : > { %3151 = vmatpush1.bf16.msra.mxu0 %v4224_v29  ;;  %3183 = vmatpush1.bf16.msra.mxu1 %v4228_v30 }
 0x4de   : > { %3153 = vmatprep.subr.bf16.mxu0 %v4230_v31  ;;  %3185 = vmatprep.subr.bf16.mxu1 %v4237_v35 }
 0x4e1   : > { %3155 = vmatpush1.bf16.msra.mxu0 %v4248_v46  ;;  %3187 = vmatpush1.bf16.msra.mxu1 %v4252_v43 }
 0x4e2   : > { %3157 = vmatprep.subr.bf16.mxu0 %v4254_v47  ;;  %3189 = vmatprep.subr.bf16.mxu1 %v4261_v52 }
 0x4e5   : > { %3159 = vmatpush1.bf16.msra.mxu0 %v4272_v63  ;;  %3191 = vmatpush1.bf16.msra.mxu1 %v4276_v0 }
 0x4e6   : > { %3161 = vmatprep.subr.bf16.mxu0 %v4278_v2  ;;  %3193 = vmatprep.subr.bf16.mxu1 %v4284_v5 }
 0x4e9   : > { %3163 = vmatpush1.bf16.msra.mxu0 %v4292_v10  ;;  %3195 = vmatpush1.bf16.msra.mxu1 %v4296_v11 }
 0x4ea   : > { %3197 = vmatprep.subr.bf16.mxu0 %v4113_v27  ;;  %3229 = vmatprep.subr.bf16.mxu1 %v4116_v28 }
 0x59f   : > { %v1885_v33 = vpop.f32.mrb[8].mxu0  ;;  %v1956_v38 = vpop.f32.mrb[8].mxu1 }
 0x5a0   : > { %v3341_v39 = vadd.f32 %v4344_v34, %v1885_v33  ;;  %v1887_v50 = vpop.f32.mrb[9].mxu0  ;;  %v1958_v51 = vpop.f32.mrb[9].mxu1  ;;  %v3373_v4 = vadd.f32 %v4353_v7, %v1956_v38 }
 0x5a1   : > { %v3343_v53 = vadd.f32 %v4346_v37, %v1887_v50  ;;  %v3375_v60 = vadd.f32 %v4350_v57, %v1958_v51 }
 0x5a2   : > { %v2668_v56 = vmul.f32 -1.442695, %v3341_v39 }
 0x5a3   : > { %v2669_v59 = vmul.f32 -1.442695, %v3343_v53  ;;  %v2670_v61 = vmul.f32 -1.442695, %v3375_v60 }
 0x5a4   : > { %3565 = vpow2.f32 %v2668_v56 }
 0x5a5   : > { %3567 = vpow2.f32 %v2669_v59 }
 0x5a6   : > { %3569 = vpow2.f32 %v2670_v61 }
 0x5a7   : > { %3571 = vtanh.f32 %v3373_v4 }
 0x5ae   : > { %v3566_v8 = vpop.eup %3565 }
 0x5af   : > { %v3568_v9 = vpop.eup %3567  ;;  %v1974_v12 = vadd.f32 1.0, %v3566_v8 }
 0x5b0   : > { %v1975_v22 = vadd.f32 1.0, %v3568_v9  ;;  %v3570_v16 = vpop.eup %3569 }
 0x5b1   : > { %3573 = vrcp.f32 %v1974_v12  ;;  %v3572_v19 = vpop.eup %3571  ;;  %v1976_v25 = vadd.f32 1.0, %v3570_v16 }
 0x5b2   : > { %3575 = vrcp.f32 %v1975_v22 }
 0x5b3   : > { %3577 = vrcp.f32 %v1976_v25 }
 0x5bb   : > { %v3574_v21 = vpop.eup %3573 }
 0x5bc   : > { %v3576_v23 = vpop.eup %3575  ;;  %v1984_v24 = vmul.f32 %v3574_v21, %v4488_v32 }
 0x5bd   : > { %v1985_v26 = vmul.f32 %v3576_v23, %v3572_v19  ;;  %v3578_v40 = vpop.eup %3577 }
 0x5bf   : > { %v4532_v18 = vadd.f32 %v1985_v26, %v1984_v24 }
 0x5c1   : > { %3579 = vtanh.f32 %v4532_v18 }
 0x5cb   : > { %v3580_v44 = vpop.eup %3579 }
 0x5cc   : > { %v1988_v48 = vmul.f32 %v3580_v44, %v3578_v40 }
 0x5ce   : > { %1989 = vst.msk [vmem:[#allocation2 + $0x20] sm:$0xff] %vm1226_vm0, %v1988_v48  ;;  %2068 = vmatmul.mubr.f32.vlgmr.msra.gmra.mrb[10].mxu0 %v1988_v48  ;;  %2139 = vmatmul.mubr.f32.vlgmr.msra.gmra.mrb[10].mxu1 %v1988_v48 }
 0x5cf   : > { %1990 = vst.msk [vmem:[#allocation2 + $0x18] sm:$0xff] %vm1229_vm1, %v1988_v48  ;;  %3199 = vmatpush1.bf16.msra.mxu0 %v4129_v36  ;;  %3231 = vmatpush1.bf16.msra.mxu1 %v4137_v42 }
 0x5d0   : > { %3201 = vmatprep.subr.bf16.mxu0 %v4135_v41  ;;  %3233 = vmatprep.subr.bf16.mxu1 %v4141_v45 }
 0x5d1   : > { %2251 = vmatprep.mubr.f32.mxu0 %v3735_v15  ;;  %2322 = vmatprep.mubr.f32.mxu1 %v3735_v15 }
 0x5d3   : > { %3203 = vmatpush1.bf16.msra.mxu0 %v4148_v49  ;;  %3235 = vmatpush1.bf16.msra.mxu1 %v4160_v55 }
 0x5d4   : > { %3205 = vmatprep.subr.bf16.mxu0 %v4158_v54  ;;  %3237 = vmatprep.subr.bf16.mxu1 %v4165_v58 }
 0x5d5   : > { %v2549_v33 = vld [vmem:[#allocation2 + $0x20] sm:$0xff] }
 0x5d6   : > { %v2548_v32 = vld [vmem:[#allocation2 + $0x18] sm:$0xff]  ;;  %2557 = vst [vmem:[%s4671_s4 + $0x20] sm:$0xff] %v2549_v33 }
 0x5d7   : > { %2556 = vst [vmem:[%s4671_s4 + $0x18] sm:$0xff] %v2548_v32  ;;  %3207 = vmatpush1.bf16.msra.mxu0 %v4172_v62  ;;  %3239 = vmatpush1.bf16.msra.mxu1 %v4180_v3 }
 0x5d8   : > { %3209 = vmatprep.subr.bf16.mxu0 %v4182_v1  ;;  %3241 = vmatprep.subr.bf16.mxu1 %v4189_v6 }
 0x5db   : > { %3211 = vmatpush1.bf16.msra.mxu0 %v4200_v13  ;;  %3243 = vmatpush1.bf16.msra.mxu1 %v4204_v17 }
 0x5dc   : > { %3213 = vmatprep.subr.bf16.mxu0 %v4206_v14  ;;  %3245 = vmatprep.subr.bf16.mxu1 %v4213_v20 }
 0x5df   : > { %3215 = vmatpush1.bf16.msra.mxu0 %v4224_v29  ;;  %3247 = vmatpush1.bf16.msra.mxu1 %v4228_v30 }
 0x5e0   : > { %3217 = vmatprep.subr.bf16.mxu0 %v4230_v31  ;;  %3249 = vmatprep.subr.bf16.mxu1 %v4237_v35 }
 0x5e3   : > { %3219 = vmatpush1.bf16.msra.mxu0 %v4248_v46  ;;  %3251 = vmatpush1.bf16.msra.mxu1 %v4252_v43 }
 0x5e4   : > { %3221 = vmatprep.subr.bf16.mxu0 %v4254_v47  ;;  %3253 = vmatprep.subr.bf16.mxu1 %v4261_v52 }
 0x5e7   : > { %3223 = vmatpush1.bf16.msra.mxu0 %v4272_v63  ;;  %3255 = vmatpush1.bf16.msra.mxu1 %v4276_v0 }
 0x5e8   : > { %3225 = vmatprep.subr.bf16.mxu0 %v4278_v2  ;;  %3257 = vmatprep.subr.bf16.mxu1 %v4284_v5 }
 0x5eb   : > { %3227 = vmatpush1.bf16.msra.mxu0 %v4292_v10  ;;  %3259 = vmatpush1.bf16.msra.mxu1 %v4296_v11 }
 0x5ec   : > { %3261 = vmatprep.subr.bf16.mxu0 %v4113_v27  ;;  %3293 = vmatprep.subr.bf16.mxu1 %v4116_v28 }
 0x6a1   : > { %v2069_v38 = vpop.f32.mrb[10].mxu0  ;;  %v2140_v39 = vpop.f32.mrb[10].mxu1 }
 0x6a2   : > { %v3345_v50 = vadd.f32 %v4344_v34, %v2069_v38  ;;  %v2071_v51 = vpop.f32.mrb[11].mxu0  ;;  %v2142_v53 = vpop.f32.mrb[11].mxu1  ;;  %v3377_v8 = vadd.f32 %v4353_v7, %v2140_v39 }
 0x6a3   : > { %v3347_v56 = vadd.f32 %v4346_v37, %v2071_v51  ;;  %v3379_v61 = vadd.f32 %v4350_v57, %v2142_v53 }
 0x6a4   : > { %v2671_v59 = vmul.f32 -1.442695, %v3345_v50 }
 0x6a5   : > { %v2672_v60 = vmul.f32 -1.442695, %v3347_v56  ;;  %v2673_v4 = vmul.f32 -1.442695, %v3379_v61 }
 0x6a6   : > { %3581 = vpow2.f32 %v2671_v59 }
 0x6a7   : > { %3583 = vpow2.f32 %v2672_v60 }
 0x6a8   : > { %3585 = vpow2.f32 %v2673_v4 }
 0x6a9   : > { %3587 = vtanh.f32 %v3377_v8 }
 0x6b0   : > { %v3582_v27 = vpop.eup %3581 }
 0x6b1   : > { %v3584_v9 = vpop.eup %3583  ;;  %v2158_v28 = vadd.f32 1.0, %v3582_v27 }
 0x6b2   : > { %v2159_v12 = vadd.f32 1.0, %v3584_v9  ;;  %v3586_v22 = vpop.eup %3585 }
 0x6b3   : > { %3589 = vrcp.f32 %v2158_v28  ;;  %v3588_v16 = vpop.eup %3587  ;;  %v2160_v24 = vadd.f32 1.0, %v3586_v22 }
 0x6b4   : > { %3591 = vrcp.f32 %v2159_v12 }
 0x6b5   : > { %3593 = vrcp.f32 %v2160_v24 }
 0x6bd   : > { %v3590_v19 = vpop.eup %3589 }
 0x6be   : > { %v3592_v21 = vpop.eup %3591  ;;  %v2168_v23 = vmul.f32 %v3590_v19, %v4532_v18 }
 0x6bf   : > { %v2169_v25 = vmul.f32 %v3592_v21, %v3588_v16  ;;  %v3594_v40 = vpop.eup %3593 }
 0x6c1   : > { %v4582_v26 = vadd.f32 %v2169_v25, %v2168_v23 }
 0x6c3   : > { %3595 = vtanh.f32 %v4582_v26 }
 0x6cd   : > { %v3596_v44 = vpop.eup %3595 }
 0x6ce   : > { %v2172_v48 = vmul.f32 %v3596_v44, %v3594_v40 }
 0x6d0   : > { %2173 = vst.msk [vmem:[#allocation2 + $0x28] sm:$0xff] %vm1226_vm0, %v2172_v48  ;;  %2252 = vmatmul.mubr.f32.vlgmr.msra.gmra.mrb[12].mxu0 %v2172_v48  ;;  %2323 = vmatmul.mubr.f32.vlgmr.msra.gmra.mrb[12].mxu1 %v2172_v48 }
 0x6d1   : > { %2174 = vst.msk [vmem:[#allocation2 + $0x10] sm:$0xff] %vm1229_vm1, %v2172_v48  ;;  %3263 = vmatpush1.bf16.msra.mxu0 %v4129_v36  ;;  %3295 = vmatpush1.bf16.msra.mxu1 %v4137_v42 }
 0x6d2   : > { %3265 = vmatprep.subr.bf16.mxu0 %v4135_v41  ;;  %3297 = vmatprep.subr.bf16.mxu1 %v4141_v45 }
 0x6d3   : > { %2435 = vmatprep.mubr.f32.mxu0 %v3735_v15  ;;  %2506 = vmatprep.mubr.f32.mxu1 %v3735_v15 }
 0x6d5   : > { %3267 = vmatpush1.bf16.msra.mxu0 %v4148_v49  ;;  %3299 = vmatpush1.bf16.msra.mxu1 %v4160_v55 }
 0x6d6   : > { %3269 = vmatprep.subr.bf16.mxu0 %v4158_v54  ;;  %3301 = vmatprep.subr.bf16.mxu1 %v4165_v58 }
 0x6d7   : > { %v2550_v36 = vld [vmem:[#allocation2 + $0x28] sm:$0xff] }
 0x6d8   : > { %v2547_v18 = vld [vmem:[#allocation2 + $0x10] sm:$0xff]  ;;  %2558 = vst [vmem:[%s4671_s4 + $0x28] sm:$0xff] %v2550_v36 }
 0x6d9   : > { %2555 = vst [vmem:[%s4671_s4 + $0x10] sm:$0xff] %v2547_v18  ;;  %3271 = vmatpush1.bf16.msra.mxu0 %v4172_v62  ;;  %3303 = vmatpush1.bf16.msra.mxu1 %v4180_v3 }
 0x6da   : > { %3273 = vmatprep.subr.bf16.mxu0 %v4182_v1  ;;  %3305 = vmatprep.subr.bf16.mxu1 %v4189_v6 }
 0x6dd   : > { %3275 = vmatpush1.bf16.msra.mxu0 %v4200_v13  ;;  %3307 = vmatpush1.bf16.msra.mxu1 %v4204_v17 }
 0x6de   : > { %3277 = vmatprep.subr.bf16.mxu0 %v4206_v14  ;;  %3309 = vmatprep.subr.bf16.mxu1 %v4213_v20 }
 0x6e1   : > { %3279 = vmatpush1.bf16.msra.mxu0 %v4224_v29  ;;  %3311 = vmatpush1.bf16.msra.mxu1 %v4228_v30 }
 0x6e2   : > { %3281 = vmatprep.subr.bf16.mxu0 %v4230_v31  ;;  %3313 = vmatprep.subr.bf16.mxu1 %v4237_v35 }
 0x6e5   : > { %3283 = vmatpush1.bf16.msra.mxu0 %v4248_v46  ;;  %3315 = vmatpush1.bf16.msra.mxu1 %v4252_v43 }
 0x6e6   : > { %3285 = vmatprep.subr.bf16.mxu0 %v4254_v47  ;;  %3317 = vmatprep.subr.bf16.mxu1 %v4261_v52 }
 0x6e9   : > { %3287 = vmatpush1.bf16.msra.mxu0 %v4272_v63  ;;  %3319 = vmatpush1.bf16.msra.mxu1 %v4276_v0 }
 0x6ea   : > { %3289 = vmatprep.subr.bf16.mxu0 %v4278_v2  ;;  %3321 = vmatprep.subr.bf16.mxu1 %v4284_v5 }
 0x6ed   : > { %3291 = vmatpush1.bf16.msra.mxu0 %v4292_v10  ;;  %3323 = vmatpush1.bf16.msra.mxu1 %v4296_v11 }
 0x7a3   : > { %v2253_v41 = vpop.f32.mrb[12].mxu0  ;;  %v2324_v42 = vpop.f32.mrb[12].mxu1 }
 0x7a4   : > { %v3349_v45 = vadd.f32 %v4344_v34, %v2253_v41  ;;  %v2255_v49 = vpop.f32.mrb[13].mxu0  ;;  %v2326_v54 = vpop.f32.mrb[13].mxu1  ;;  %v3381_v6 = vadd.f32 %v4353_v7, %v2324_v42 }
 0x7a5   : > { %v3351_v55 = vadd.f32 %v4346_v37, %v2255_v49  ;;  %v3383_v3 = vadd.f32 %v4350_v57, %v2326_v54 }
 0x7a6   : > { %v2674_v58 = vmul.f32 -1.442695, %v3349_v45 }
 0x7a7   : > { %v2675_v62 = vmul.f32 -1.442695, %v3351_v55  ;;  %v2676_v1 = vmul.f32 -1.442695, %v3383_v3 }
 0x7a8   : > { %3597 = vpow2.f32 %v2674_v58 }
 0x7a9   : > { %3599 = vpow2.f32 %v2675_v62 }
 0x7aa   : > { %3601 = vpow2.f32 %v2676_v1 }
 0x7ab   : > { %3603 = vtanh.f32 %v3381_v6 }
 0x7b2   : > { %v3598_v13 = vpop.eup %3597 }
 0x7b3   : > { %v3600_v17 = vpop.eup %3599  ;;  %v2342_v14 = vadd.f32 1.0, %v3598_v13 }
 0x7b4   : > { %v2343_v20 = vadd.f32 1.0, %v3600_v17  ;;  %v3602_v29 = vpop.eup %3601 }
 0x7b5   : > { %3605 = vrcp.f32 %v2342_v14  ;;  %v3604_v30 = vpop.eup %3603  ;;  %v2344_v43 = vadd.f32 1.0, %v3602_v29 }
 0x7b6   : > { %3607 = vrcp.f32 %v2343_v20 }
 0x7b7   : > { %3609 = vrcp.f32 %v2344_v43 }
 0x7bf   : > { %v3606_v31 = vpop.eup %3605 }
 0x7c0   : > { %v3608_v35 = vpop.eup %3607  ;;  %v2352_v46 = vmul.f32 %v3606_v31, %v4582_v26 }
 0x7c1   : > { %v2353_v47 = vmul.f32 %v3608_v35, %v3604_v30  ;;  %v3610_v63 = vpop.eup %3609 }
 0x7c3   : > { %v2354_v52 = vadd.f32 %v2353_v47, %v2352_v46 }
 0x7c5   : > { %3611 = vtanh.f32 %v2354_v52 }
 0x7cf   : > { %v3612_v0 = vpop.eup %3611 }
 0x7d0   : > { %v2356_v2 = vmul.f32 %v3612_v0, %v3610_v63 }
 0x7d2   : > { %2357 = vst.msk [vmem:[#allocation2 + $0x30] sm:$0xff] %vm1226_vm0, %v2356_v2  ;;  %2436 = vmatmul.mubr.f32.vlgmr.msra.gmra.mrb[14].mxu0 %v2356_v2  ;;  %2507 = vmatmul.mubr.f32.vlgmr.msra.gmra.mrb[14].mxu1 %v2356_v2 }
 0x7d3   : > { %2358 = vst.msk [vmem:[#allocation2 + $0x8] sm:$0xff] %vm1229_vm1, %v2356_v2 }
 0x7d9   : > { %v2551_v10 = vld [vmem:[#allocation2 + $0x30] sm:$0xff] }
 0x7da   : > { %v2546_v5 = vld [vmem:[#allocation2 + $0x8] sm:$0xff]  ;;  %2559 = vst [vmem:[%s4671_s4 + $0x30] sm:$0xff] %v2551_v10 }
 0x7db   : > { %2554 = vst [vmem:[%s4671_s4 + $0x8] sm:$0xff] %v2546_v5 }
 0x8a5   : > { %v2437_v11 = vpop.f32.mrb[14].mxu0  ;;  %v2508_v32 = vpop.f32.mrb[14].mxu1 }
 0x8a6   : > { %v3353_v33 = vadd.f32 %v4344_v34, %v2437_v11  ;;  %v2439_v38 = vpop.f32.mrb[15].mxu0  ;;  %v2510_v39 = vpop.f32.mrb[15].mxu1  ;;  %v3385_v60 = vadd.f32 %v4353_v7, %v2508_v32 }
 0x8a7   : > { %v3355_v50 = vadd.f32 %v4346_v37, %v2439_v38  ;;  %v3387_v56 = vadd.f32 %v4350_v57, %v2510_v39 }
 0x8a8   : > { %v2677_v51 = vmul.f32 -1.442695, %v3353_v33 }
 0x8a9   : > { %v2678_v53 = vmul.f32 -1.442695, %v3355_v50  ;;  %v2679_v59 = vmul.f32 -1.442695, %v3387_v56 }
 0x8aa   : > { %3613 = vpow2.f32 %v2677_v51 }
 0x8ab   : > { %3615 = vpow2.f32 %v2678_v53 }
 0x8ac   : > { %3617 = vpow2.f32 %v2679_v59 }
 0x8ad   : > { %3619 = vtanh.f32 %v3385_v60 }
 0x8b4   : > { %v3614_v61 = vpop.eup %3613 }
 0x8b5   : > { %v3616_v4 = vpop.eup %3615  ;;  %v2526_v8 = vadd.f32 1.0, %v3614_v61 }
 0x8b6   : > { %v2527_v27 = vadd.f32 1.0, %v3616_v4  ;;  %v3618_v34 = vpop.eup %3617 }
 0x8b7   : > { %3621 = vrcp.f32 %v2526_v8  ;;  %v3620_v9 = vpop.eup %3619  ;;  %v2528_v22 = vadd.f32 1.0, %v3618_v34 }
 0x8b8   : > { %3623 = vrcp.f32 %v2527_v27 }
 0x8b9   : > { %3625 = vrcp.f32 %v2528_v22 }
 0x8c1   : > { %v3622_v37 = vpop.eup %3621 }
 0x8c2   : > { %v3624_v28 = vpop.eup %3623  ;;  %v2536_v12 = vmul.f32 %v3622_v37, %v2354_v52 }
 0x8c3   : > { %v2537_v16 = vmul.f32 %v3624_v28, %v3620_v9  ;;  %v3626_v57 = vpop.eup %3625 }
 0x8c5   : > { %v2538_v19 = vadd.f32 %v2537_v16, %v2536_v12 }
 0x8c7   : > { %3627 = vtanh.f32 %v2538_v19 }
 0x8d1   : > { %v3628_v7 = vpop.eup %3627 }
 0x8d2   : > { %v2540_v21 = vmul.f32 %v3628_v7, %v3626_v57 }
 0x8d4   : > { %2541 = vst.msk [vmem:[#allocation2 + $0x38] sm:$0xff] %vm1226_vm0, %v2540_v21 }
 0x8d5   : > { %2542 = vst.msk [vmem:[#allocation2] sm:$0xff] %vm1229_vm1, %v2540_v21 }
 0x8d6   : > { %2543 = vst.msk [vmem:[#allocation2 + $0x38] sm:$0xff] %vm1226_vm0, %v3735_v15 }
 0x8d7   : > { %2544 = vst.msk [vmem:[#allocation2] sm:$0xff] %vm1229_vm1, %v3735_v15 }
 0x8dd   : > { %v2552_v24 = vld [vmem:[#allocation2 + $0x38] sm:$0xff] }
 0x8de   : > { %v2545_v23 = vld [vmem:[#allocation2] sm:$0xff]  ;;  %2560 = vst [vmem:[%s4671_s4 + $0x38] sm:$0xff] %v2552_v24 }
 0x8df   : > { %2553 = vst [vmem:[%s4671_s4] sm:$0xff] %v2545_v23 }
 0x8e0 PF: > { %p17_p3 = scmp.ge.s32.totalorder %s3783_s20, 4   ;;  %s4678_s15 = smov %s3719_s16 }
 0x8e1   : > { %s4679_s16 = smov %s3723_s17  ;;  %s4680_s17 = smov %s3793_s23 }
 0x8e2   : > { %s4681_s18 = smov %s3783_s20  ;;  %19 = sbr.rel (!%p17_p3) target bundleno = 5 (0x5), region = 107 }
 0x8e9   :  { %2572 = vsyncpa [#allocation5], 1 }
 0x8ea   :  { %2574 = vsyncpa [#allocation5 + $0x1], 1 }
 0x8eb   :  { %2575 = vsyncpa [#allocation7], 1 }
 0x8ec   :  { %2577 = vsyncpa [#allocation7 + $0x1], 1 }

</bundles_post_ra>
